<compile_context>
chip_gen: v7x
topology: tpu7x:2x2x1
jax: 0.10.0
libtpu: 0.0.40
codegen_flags: <defaults>
</compile_context>

<pallas_src>
import numpy as np
import jax
import jax.numpy as jnp
from jax import lax
from jax.experimental import pallas as pl
from jax.experimental.pallas import tpu as pltpu

# Multi-band globals from the original module; only Nr[3], K[3] matter for Encoder_24k.
Nr = [2, 2, 2, 4]
K = [2, 2, 2, 4]

B = 2                     # batch size
S = Nr[3] * K[3]          # spatial size = 16
NTAP = (S - 1) * B        # rows fed to the first conv (H taps pre-merged into lanes) = 30

# Trunk slab (conv1..conv4) row ranges; streamed HBM->VMEM inside the kernel.
_TRUNK_SLICES = ((0, 1024), (1024, 512), (1536, 512), (2048, 512))
_TRUNK_ROWS = 2560


# ------------------------------------------------------------------ index helpers (host)

def _q(i):
    """reorder/order_back index map for the 4x4 digit swap (an involution)."""
    return 4 * (i % 4) + i // 4


def _bitrev(g, nbits):
    r = 0
    for k in range(nbits):
        r |= ((g >> k) & 1) << (nbits - 1 - k)
    return r


def _sel(n_in, n_out, fn):
    m = np.zeros((n_in, n_out), np.float32)
    for j in range(n_in):
        for jo in range(n_out):
            if fn(j, jo):
                m[j, jo] = 1.0
    return m


# ------------------------------------------------------------------ weight packing (host)

def _pack_stride1(wc):
    """Conv2d(k=2,s=1) OIHW (Co,Ci,2,2) -> (2, 16*Ci, 15*Co).  Leading index = H tap;
    the W taps are absorbed into the matrix.  In lanes: (j, ci); out lanes: (j', co)."""
    co, ci = wc.shape[0], wc.shape[1]
    mats = []
    for di in range(2):
        m = jnp.zeros((16 * ci, 15 * co), jnp.float32)
        for dj in range(2):
            sjj = _sel(16, 15, lambda j, jo, dj=dj: j == jo + dj)
            m = m + jnp.einsum('jJ,oc->jcJo', sjj, wc[:, :, di, dj]).reshape(16 * ci, 15 * co)
        mats.append(m)
    return jnp.stack(mats)


def _pack_deconv(wd):
    """ConvTranspose2d(k=2,s=1) IOHW (8,8,2,2) -> (4, 60, 128) pieces ordered
    [di=0 pos, di=0 neg, di=1 pos, di=1 neg].  pos/neg = AntiRectifier halves of the
    preceding pre-activation conv output; the column scatter (incl. its zero padding)
    is absorbed into the matrices.  In lanes: (j, co_pre); out lanes: (j'', co)."""
    mats = []
    for di in range(2):
        for lo in (0, 4):
            m = jnp.zeros((15 * 4, 16 * 8), jnp.float32)
            for dj in range(2):
                sjj = _sel(15, 16, lambda j, jo, dj=dj: jo == j + dj)
                m = m + jnp.einsum('jJ,co->jcJo', sjj,
                                   wd[lo:lo + 4, :, di, dj]).reshape(15 * 4, 16 * 8)
            mats.append(m)
    return jnp.stack(mats)


def _pack_rowmix(row_of_group):
    """(2, 16*B, 15*B) constant 0/1 matrices folding the ConvTranspose row scatter with the
    permutation from natural deconv-output rows to the (bit-reversed, order_back'ed) row
    order consumed by conv1."""
    mats = []
    for di in range(2):
        m = np.zeros((16 * B, 15 * B), np.float32)
        for g in range(16):
            i = row_of_group[g] - di
            if 0 <= i < 15:
                for b in range(B):
                    m[g * B + b, i * B + b] = 1.0
        mats.append(m)
    return jnp.asarray(np.stack(mats))


def _pack_conv1(w1):
    """conv1 (16,32,2,2) -> (4, 256, 128) pieces [t=0 pos, t=0 neg, t=1 pos, t=1 neg].
    K lanes = [x block (j, c) | y block (j_raw, c)]; the order_back column permutation of
    the y branch and the stride-2 column taps are absorbed here."""
    sx = [_sel(16, 8, lambda j, jo, dj=dj: j == 2 * jo + dj) for dj in range(2)]
    sy = [_sel(16, 8, lambda j, jo, dj=dj: _q(j) == 2 * jo + dj) for dj in range(2)]
    mats = []
    for t in range(2):
        for coff in (0, 16):                      # antirectifier pos / neg halves
            blocks = []
            for smats, ch0 in ((sx, 0), (sy, 8)):  # x channels 0..7, y channels 8..15
                m = jnp.zeros((16 * 8, 8 * 16), jnp.float32)
                for dj in range(2):
                    m = m + jnp.einsum(
                        'jJ,oc->jcJo', smats[dj],
                        w1[:, coff + ch0:coff + ch0 + 8, t, dj]).reshape(16 * 8, 8 * 16)
                blocks.append(m)
            mats.append(jnp.concatenate(blocks, axis=0))
    return jnp.stack(mats)


def _pack_s2(w, wi, wo):
    """Stride-2 conv (Co, 2*Cp, 2, 2) consuming the previous conv's pre-activation output
    (Cp channels; AntiRectifier folded as pos/neg split) -> (4, wi*Cp, wo*Co)."""
    co = w.shape[0]
    cp = w.shape[1] // 2
    mats = []
    for t in range(2):
        for coff in (0, cp):
            m = jnp.zeros((wi * cp, wo * co), jnp.float32)
            for dj in range(2):
                sjj = _sel(wi, wo, lambda j, jo, dj=dj: j == 2 * jo + dj)
                m = m + jnp.einsum('jJ,oc->jcJo', sjj,
                                   w[:, coff:coff + cp, t, dj]).reshape(wi * cp, wo * co)
            mats.append(m)
    return jnp.stack(mats)


def init_raw_params(key):
    ks = jax.random.split(key, 16)

    def rnd(k, shape, scale=0.1):
        return jax.random.normal(k, shape, jnp.float32) * scale

    return {
        'yconv_w': rnd(ks[0], (4, 2, 2, 2)),     'yconv_b': rnd(ks[1], (4,)),
        'xconv_w': rnd(ks[2], (4, 2, 2, 2)),     'xconv_b': rnd(ks[3], (4,)),
        'ydeconv_w': rnd(ks[4], (8, 8, 2, 2)),   'ydeconv_b': rnd(ks[5], (8,)),
        'xdeconv_w': rnd(ks[6], (8, 8, 2, 2)),   'xdeconv_b': rnd(ks[7], (8,)),
        'conv1_w': rnd(ks[8], (16, 32, 2, 2)),   'conv1_b': rnd(ks[9], (16,)),
        'conv2_w': rnd(ks[10], (32, 32, 2, 2)),  'conv2_b': rnd(ks[11], (32,)),
        'conv3_w': rnd(ks[12], (64, 64, 2, 2)),  'conv3_b': rnd(ks[13], (64,)),
        'conv4_w': rnd(ks[14], (128, 128, 2, 2)), 'conv4_b': rnd(ks[15], (128,)),
    }


def pack_params(raw):
    """Assemble the validated per-tap/per-sign pieces into merged bf16 slabs."""
    f32 = jnp.float32
    br4 = [_bitrev(g, 4) for g in range(16)]

    # ---- branch conv (x and y fused block-diagonally), padded to 128 output lanes ----
    ax = _pack_stride1(raw['xconv_w'])            # (2, 32, 60)
    ay = _pack_stride1(raw['yconv_w'])
    wc = jnp.zeros((128, 128), f32)
    wc = wc.at[0:32, 0:60].set(ax[0]).at[32:64, 0:60].set(ax[1])
    wc = wc.at[64:96, 60:120].set(ay[0]).at[96:128, 60:120].set(ay[1])

    # ---- branch deconv (pos/neg + both H taps + both branches in ONE (256,512) dot) ----
    dx = _pack_deconv(raw['xdeconv_w'])           # (4, 60, 128): [t0+, t0-, t1+, t1-]
    dy = _pack_deconv(raw['ydeconv_w'])
    wd = jnp.zeros((256, 512), f32)               # rows 120:128 / 248:256 stay zero (lane pad)
    wd = wd.at[0:60, 0:128].set(dx[0]).at[0:60, 128:256].set(dx[2])            # x+
    wd = wd.at[60:120, 256:384].set(dy[0]).at[60:120, 384:512].set(dy[2])      # y+
    wd = wd.at[128:188, 0:128].set(dx[1]).at[128:188, 128:256].set(dx[3])      # x-
    wd = wd.at[188:248, 256:384].set(dy[1]).at[188:248, 384:512].set(dy[3])    # y-

    # ---- rowmix (deconv row scatter + reorder to conv1 row order) + skip un-permute ----
    px = _pack_rowmix(br4)                        # (2, 32, 30)
    py = _pack_rowmix([_q(i) for i in br4])
    pbr = np.zeros((8 * B, 8 * B), np.float32)    # bit-reversal of x_skip rows, in-kernel
    for h in range(8):
        g = _bitrev(h, 3)
        for b in range(B):
            pbr[h * B + b, g * B + b] = 1.0

    wres = jnp.zeros((272, 128), f32)             # one resident constant slab
    wres = wres.at[0:128, :].set(wc)
    wres = wres.at[128:160, 0:30].set(px[0]).at[160:192, 0:30].set(px[1])
    wres = wres.at[192:224, 0:30].set(py[0]).at[224:256, 0:30].set(py[1])
    wres = wres.at[256:272, 0:16].set(jnp.asarray(pbr))

    # ---- trunk: conv1..conv4 with AntiRectifier + both H taps folded into K ----
    c1 = _pack_conv1(raw['conv1_w']).reshape(1024, 128)
    c2 = _pack_s2(raw['conv2_w'], 8, 4).reshape(512, 128)
    c3 = _pack_s2(raw['conv3_w'], 4, 2).reshape(512, 128)
    c4 = _pack_s2(raw['conv4_w'], 2, 1).reshape(512, 128)
    wtrunk = jnp.concatenate([c1, c2, c3, c4], axis=0)      # (2560, 128)

    bias = jnp.zeros((8, 128), f32)
    bias = bias.at[0, 0:60].set(jnp.tile(raw['xconv_b'], 15))
    bias = bias.at[0, 60:120].set(jnp.tile(raw['yconv_b'], 15))
    bias = bias.at[1, :].set(jnp.tile(raw['xdeconv_b'], 16))
    bias = bias.at[2, :].set(jnp.tile(raw['ydeconv_b'], 16))
    bias = bias.at[3, :].set(jnp.tile(raw['conv1_b'], 8))
    bias = bias.at[4, :].set(jnp.tile(raw['conv2_b'], 4))
    bias = bias.at[5, :].set(jnp.tile(raw['conv3_b'], 2))
    bias = bias.at[6, :].set(raw['conv4_b'])

    return {'wres': wres.astype(jnp.bfloat16),
            'wdec': wd.astype(jnp.bfloat16),
            'wtrunk': wtrunk.astype(jnp.bfloat16),
            'bias': bias}


# ----------------------------------------------------------------------------- the kernel

def _encoder_kernel(inv_ref, xin_ref, wres_ref, wdec_ref, bias_ref, wtrunk_hbm,
                    out_ref, skip_ref, wtk_ref, sems):
    f32 = jnp.float32
    bf16 = jnp.bfloat16

    # Stream the conv1..conv4 slab HBM->VMEM right away (one DMA per layer), so the
    # copies overlap the branch-stage compute and each conv waits only on its own chunk.
    copies = []
    for idx, (r0, rows) in enumerate(_TRUNK_SLICES):
        cp = pltpu.make_async_copy(wtrunk_hbm.at[pl.ds(r0, rows)],
                                   wtk_ref.at[pl.ds(r0, rows)], sems.at[idx])
        cp.start()
        copies.append(cp)

    # torch.nn.functional.normalize(x, p=2, dim=(1,2), eps=1e-12): per-sample scale
    # (exact inverse norm computed in the wrapper; applied here as a row-broadcast mul).
    v = xin_ref[...] * inv_ref[...]                                      # (30, 128) f32
    vb = v.astype(bf16)

    # ---- branch stage: x & y Conv2d(2->4,k2,s1) fused into one block-diagonal dot ----
    pre = (jnp.dot(vb, wres_ref[0:128, :], preferred_element_type=f32)
           + bias_ref[0:1, :])                                           # (30, 128) [x|y|0pad]
    # AntiRectifier + both ConvTranspose H taps + both branches in ONE (256,512) dot.
    lhs = jnp.concatenate([jnp.maximum(pre, 0.0), jnp.maximum(-pre, 0.0)],
                          axis=-1).astype(bf16)                          # (30, 256)
    dec = jnp.dot(lhs, wdec_ref[...], preferred_element_type=f32)        # (30, 512) [xt0|xt1|yt0|yt1]
    decb = dec.astype(bf16)

    # ConvTranspose row scatter + reorder to conv1 row order: constant 0/1 matmuls.
    v1x = (jnp.dot(wres_ref[128:160, 0:30], decb[:, 0:128], preferred_element_type=f32)
           + jnp.dot(wres_ref[160:192, 0:30], decb[:, 128:256], preferred_element_type=f32)
           + bias_ref[1:2, :])                                           # (32, 128)
    v1y = (jnp.dot(wres_ref[192:224, 0:30], decb[:, 256:384], preferred_element_type=f32)
           + jnp.dot(wres_ref[224:256, 0:30], decb[:, 384:512], preferred_element_type=f32)
           + bias_ref[2:3, :])
    v1 = jnp.concatenate([v1x, v1y], axis=-1)                            # (32, 256) = cat((x,y),1)
    # Dropout(p=0.3): inference-mode identity.
    # TODO(synk): training-mode dropout (random mask + 1/(1-p) scaling) not implemented.

    def taps_lhs(o):
        # AntiRectifier + both stride-2 H taps as one wide-K lhs (rows are in bit-reversed
        # order, so the taps are the two contiguous row halves; all pieces 128-lane aligned).
        m = o.shape[0]
        h0 = o[0:m // 2, :]
        h1 = o[m // 2:m, :]
        return jnp.concatenate(
            [jnp.maximum(h0, 0.0), jnp.maximum(-h0, 0.0),
             jnp.maximum(h1, 0.0), jnp.maximum(-h1, 0.0)], axis=-1).astype(bf16)

    # ---- trunk stage: conv1..conv4, each a single (M, 4*K) x (4*K, N) dot ----
    copies[0].wait()
    o1 = (jnp.dot(taps_lhs(v1), wtk_ref[0:1024, :], preferred_element_type=f32)
          + bias_ref[3:4, :])                                            # (16, 128)

    # x_skip in natural spatial-row order: bit-reversal folded into a constant matmul.
    o1n = jnp.dot(wres_ref[256:272, 0:16], o1.astype(bf16), preferred_element_type=f32)
    skip_ref[...] = jnp.concatenate([jnp.maximum(o1n, 0.0), jnp.maximum(-o1n, 0.0)], axis=-1)

    copies[1].wait()
    o2 = (jnp.dot(taps_lhs(o1), wtk_ref[1024:1536, :], preferred_element_type=f32)
          + bias_ref[4:5, :])                                            # (8, 128)
    copies[2].wait()
    o3 = (jnp.dot(taps_lhs(o2), wtk_ref[1536:2048, :], preferred_element_type=f32)
          + bias_ref[5:6, :])                                            # (4, 128)
    copies[3].wait()
    o4 = (jnp.dot(taps_lhs(o3), wtk_ref[2048:2560, :], preferred_element_type=f32)
          + bias_ref[6:7, :])                                            # (2, 128)

    out_ref[...] = jnp.concatenate([jnp.maximum(o4, 0.0), jnp.maximum(-o4, 0.0)], axis=-1)


# ------------------------------------------------------------------------------- wrapper

def encoder_24k_forward(x_complex, params):
    """x_complex: (B, 16, 16) complex64.  Returns NCHW (x, x_skip):
    x -> (B, 256, 1, 1), x_skip -> (B, 32, 8, 8)."""
    xr = jnp.real(x_complex).astype(jnp.float32)
    xi = jnp.imag(x_complex).astype(jnp.float32)

    # Per-sample inverse L2 norm (exact, matching torch F.normalize); fuses into the
    # packing fusion below and is applied inside the kernel (keeps reductions off the
    # kernel's critical path).
    ssq = jnp.sum(xr * xr + xi * xi, axis=(1, 2))
    inv_norm = 1.0 / jnp.maximum(jnp.sqrt(ssq), 1e-12)                   # (B,)
    inv_rows = jnp.tile(inv_norm, S - 1).reshape(NTAP, 1)                # row = (i, b)

    arr = jnp.stack([xr, xi], axis=-1)                                   # (B, 16, 16, 2)
    arr_y = arr.reshape(B, 4, 4, 4, 4, 2).transpose(0, 2, 1, 4, 3, 5).reshape(B, 16, 16, 2)

    def taps(a):                                                         # (15, B, 64): both H taps in lanes
        r = a.transpose(1, 0, 2, 3).reshape(S, B, S * 2)                 # rows (i, b), lanes (j, c)
        return jnp.concatenate([r[0:S - 1], r[1:S]], axis=-1)

    xin = jnp.concatenate([taps(arr), taps(arr_y)], axis=-1).reshape(NTAP, 128)

    inputs = (inv_rows, xin, params['wres'], params['wdec'], params['bias'], params['wtrunk'])

    out, skip = pl.pallas_call(
        _encoder_kernel,
        out_shape=(jax.ShapeDtypeStruct((B, 256), jnp.float32),
                   jax.ShapeDtypeStruct((8 * B, 256), jnp.float32)),
        grid=(1,),
        in_specs=[
            pl.BlockSpec((NTAP, 1), lambda i: (0, 0)),        # inverse-norm per row
            pl.BlockSpec((NTAP, 128), lambda i: (0, 0)),      # packed input rows
            pl.BlockSpec((272, 128), lambda i: (0, 0)),       # resident constants (bf16)
            pl.BlockSpec((256, 512), lambda i: (0, 0)),       # fused deconv weights (bf16)
            pl.BlockSpec((8, 128), lambda i: (0, 0)),         # biases (f32)
            pl.BlockSpec(memory_space=pl.ANY),                # conv1..conv4 slab (HBM, manual DMA)
        ],
        out_specs=(pl.BlockSpec((B, 256), lambda i: (0, 0)),
                   pl.BlockSpec((8 * B, 256), lambda i: (0, 0))),
        scratch_shapes=[pltpu.VMEM((_TRUNK_ROWS, 128), jnp.bfloat16),
                        pltpu.SemaphoreType.DMA((4,))],
        compiler_params=pltpu.CompilerParams(dimension_semantics=("arbitrary",)),
        cost_estimate=pl.CostEstimate(flops=15_925_248, transcendentals=0,
                                      bytes_accessed=1_030_000),
    )(*inputs)

    x_out = out.reshape(B, 256, 1, 1)
    # skip rows = (natural spatial row, b); lanes = (sign, column, channel).
    x_skip = skip.reshape(8, B, 2, 8, 16).transpose(1, 2, 4, 0, 3).reshape(B, 32, 8, 8)
    return x_out, x_skip


# ------------------------------------------------------------------- plain-JAX reference

def _reference_forward(x_complex, raw):
    prec = lax.Precision.HIGHEST

    def conv(v, w, b, stride):
        o = lax.conv_general_dilated(v, w, (stride, stride), 'VALID',
                                     dimension_numbers=('NCHW', 'OIHW', 'NCHW'),
                                     precision=prec)
        return o + b.reshape(1, -1, 1, 1)

    def deconv(v, w, b):
        wf = jnp.transpose(w[:, :, ::-1, ::-1], (1, 0, 2, 3))
        vp = jnp.pad(v, ((0, 0), (0, 0), (1, 1), (1, 1)))
        o = lax.conv_general_dilated(vp, wf, (1, 1), 'VALID',
                                     dimension_numbers=('NCHW', 'OIHW', 'NCHW'),
                                     precision=prec)
        return o + b.reshape(1, -1, 1, 1)

    def antirect(v):
        return jnp.concatenate([jnp.maximum(v, 0.0), jnp.maximum(-v, 0.0)], axis=1)

    def reorder(v, nr, k):
        b_, c = v.shape[0], v.shape[1]
        return (v.reshape(b_, c, k, nr, k, nr).transpose(0, 1, 3, 2, 5, 4)
                 .reshape(b_, c, k * nr, k * nr))

    n = jnp.sqrt(jnp.sum(jnp.abs(x_complex) ** 2, axis=(1, 2), keepdims=True))
    xn = x_complex / jnp.maximum(n, 1e-12)
    x = jnp.stack([jnp.real(xn), jnp.imag(xn)], axis=1).astype(jnp.float32)

    y = reorder(x, Nr[3], K[3])
    y = antirect(conv(y, raw['yconv_w'], raw['yconv_b'], 1))
    y = deconv(y, raw['ydeconv_w'], raw['ydeconv_b'])
    y = reorder(y, K[3], Nr[3])                     # order_back

    xb = antirect(conv(x, raw['xconv_w'], raw['xconv_b'], 1))
    xb = deconv(xb, raw['xdeconv_w'], raw['xdeconv_b'])

    h = antirect(jnp.concatenate([xb, y], axis=1))  # Dropout = identity (inference)
    h1 = conv(h, raw['conv1_w'], raw['conv1_b'], 2)
    x_skip = antirect(h1)
    h2 = antirect(conv(x_skip, raw['conv2_w'], raw['conv2_b'], 2))
    h3 = antirect(conv(h2, raw['conv3_w'], raw['conv3_b'], 2))
    h4 = antirect(conv(h3, raw['conv4_w'], raw['conv4_b'], 2))
    return h4, x_skip


if __name__ == "__main__":
    key = jax.random.PRNGKey(0)
    kxr, kxi, kp = jax.random.split(key, 3)

    xr = jax.random.normal(kxr, (B, S, S), jnp.float32)
    xi = jax.random.normal(kxi, (B, S, S), jnp.float32)
    x = (xr + 1j * xi).astype(jnp.complex64)

    raw = init_raw_params(kp)
    params = pack_params(raw)

    fwd = jax.jit(encoder_24k_forward)
    out, x_skip = fwd(x, params)
    jax.block_until_ready((out, x_skip))

    assert out.shape == (B, 256, 1, 1), out.shape
    assert x_skip.shape == (B, 32, 8, 8), x_skip.shape

    # Numerical self-check against a plain-JAX/XLA reference of the PyTorch module
    # (kernel uses bf16 MXU operands, so allow a few-percent relative drift).
    ref_out, ref_skip = _reference_forward(x, raw)
    err_out = float(jnp.max(jnp.abs(out - ref_out)))
    err_skip = float(jnp.max(jnp.abs(x_skip - ref_skip)))
    tol_out = 1e-4 + 5e-2 * float(jnp.max(jnp.abs(ref_out)))
    tol_skip = 1e-4 + 5e-2 * float(jnp.max(jnp.abs(ref_skip)))
    if err_out > tol_out or err_skip > tol_skip:
        print("WARNING: mismatch vs reference: out {:.3e}, skip {:.3e}".format(err_out, err_skip))

    print("KERNEL_OK")
</pallas_src>

<mosaic_0001>
module attributes {stable_mosaic.version = 11 : i64} {
  func.func @_encoder_kernel(%arg0: i32, %arg1: memref<30x1xf32, #tpu.memory_space<vmem>>, %arg2: memref<30x128xf32, #tpu.memory_space<vmem>>, %arg3: memref<272x128xbf16, #tpu.memory_space<vmem>>, %arg4: memref<256x512xbf16, #tpu.memory_space<vmem>>, %arg5: memref<8x128xf32, #tpu.memory_space<vmem>>, %arg6: memref<2560x128xbf16, #tpu.memory_space<any>>, %arg7: memref<2x256xf32, #tpu.memory_space<vmem>>, %arg8: memref<16x256xf32, #tpu.memory_space<vmem>>, %arg9: memref<2560x128xbf16, #tpu.memory_space<vmem>>, %arg10: memref<4x!tpu.dma_semaphore, #tpu.memory_space<semaphore_mem>>) attributes {dimension_semantics = [#tpu.dimension_semantics<arbitrary>], iteration_bounds = array<i64: 1>, scalar_prefetch = 0 : i64, scratch_operands = 2 : i64, tpu.core_type = #tpu.core_type<tc>, window_params = [{pipeline_mode = #tpu.pipeline_mode<synchronous>, transform_indices = @transform_0, window_bounds = array<i64: 30, 1>}, {pipeline_mode = #tpu.pipeline_mode<synchronous>, transform_indices = @transform_1, window_bounds = array<i64: 30, 128>}, {pipeline_mode = #tpu.pipeline_mode<synchronous>, transform_indices = @transform_2, window_bounds = array<i64: 272, 128>}, {pipeline_mode = #tpu.pipeline_mode<synchronous>, transform_indices = @transform_3, window_bounds = array<i64: 256, 512>}, {pipeline_mode = #tpu.pipeline_mode<synchronous>, transform_indices = @transform_4, window_bounds = array<i64: 8, 128>}, {}, {pipeline_mode = #tpu.pipeline_mode<synchronous>, transform_indices = @transform_6, window_bounds = array<i64: 2, 256>}, {pipeline_mode = #tpu.pipeline_mode<synchronous>, transform_indices = @transform_7, window_bounds = array<i64: 16, 256>}]} {
    %c0_i32 = arith.constant 0 : i32
    %c0_i32_0 = arith.constant 0 : i32
    %c0_i32_1 = arith.constant 0 : i32
    %0 = tpu.memref_slice %arg6[%c0_i32_0, %c0_i32_1] : memref<2560x128xbf16, #tpu.memory_space<any>> -> memref<1024x128xbf16, #tpu.memory_space<any>>
    %c0_i32_2 = arith.constant 0 : i32
    %c0_i32_3 = arith.constant 0 : i32
    %1 = tpu.memref_slice %arg9[%c0_i32_2, %c0_i32_3] : memref<2560x128xbf16, #tpu.memory_space<vmem>> -> memref<1024x128xbf16, #tpu.memory_space<vmem>>
    %2 = tpu.memref_slice %arg10[%c0_i32] : memref<4x!tpu.dma_semaphore, #tpu.memory_space<semaphore_mem>> -> memref<1x!tpu.dma_semaphore, #tpu.memory_space<semaphore_mem>>
    %3 = tpu.memref_squeeze %2 : memref<1x!tpu.dma_semaphore, #tpu.memory_space<semaphore_mem>> -> memref<!tpu.dma_semaphore, #tpu.memory_space<semaphore_mem>>
    tpu.enqueue_dma source(%0 : memref<1024x128xbf16, #tpu.memory_space<any>>) target(%1 : memref<1024x128xbf16, #tpu.memory_space<vmem>>) target_semaphore(%3 : memref<!tpu.dma_semaphore, #tpu.memory_space<semaphore_mem>>)
    %c1_i32 = arith.constant 1 : i32
    %c1024_i32 = arith.constant 1024 : i32
    %c0_i32_4 = arith.constant 0 : i32
    %4 = tpu.memref_slice %arg6[%c1024_i32, %c0_i32_4] : memref<2560x128xbf16, #tpu.memory_space<any>> -> memref<512x128xbf16, #tpu.memory_space<any>>
    %c1024_i32_5 = arith.constant 1024 : i32
    %c0_i32_6 = arith.constant 0 : i32
    %5 = tpu.memref_slice %arg9[%c1024_i32_5, %c0_i32_6] : memref<2560x128xbf16, #tpu.memory_space<vmem>> -> memref<512x128xbf16, #tpu.memory_space<vmem>>
    %6 = tpu.memref_slice %arg10[%c1_i32] : memref<4x!tpu.dma_semaphore, #tpu.memory_space<semaphore_mem>> -> memref<1x!tpu.dma_semaphore, #tpu.memory_space<semaphore_mem>>
    %7 = tpu.memref_squeeze %6 : memref<1x!tpu.dma_semaphore, #tpu.memory_space<semaphore_mem>> -> memref<!tpu.dma_semaphore, #tpu.memory_space<semaphore_mem>>
    tpu.enqueue_dma source(%4 : memref<512x128xbf16, #tpu.memory_space<any>>) target(%5 : memref<512x128xbf16, #tpu.memory_space<vmem>>) target_semaphore(%7 : memref<!tpu.dma_semaphore, #tpu.memory_space<semaphore_mem>>)
    %c2_i32 = arith.constant 2 : i32
    %c1536_i32 = arith.constant 1536 : i32
    %c0_i32_7 = arith.constant 0 : i32
    %8 = tpu.memref_slice %arg6[%c1536_i32, %c0_i32_7] : memref<2560x128xbf16, #tpu.memory_space<any>> -> memref<512x128xbf16, #tpu.memory_space<any>>
    %c1536_i32_8 = arith.constant 1536 : i32
    %c0_i32_9 = arith.constant 0 : i32
    %9 = tpu.memref_slice %arg9[%c1536_i32_8, %c0_i32_9] : memref<2560x128xbf16, #tpu.memory_space<vmem>> -> memref<512x128xbf16, #tpu.memory_space<vmem>>
    %10 = tpu.memref_slice %arg10[%c2_i32] : memref<4x!tpu.dma_semaphore, #tpu.memory_space<semaphore_mem>> -> memref<1x!tpu.dma_semaphore, #tpu.memory_space<semaphore_mem>>
    %11 = tpu.memref_squeeze %10 : memref<1x!tpu.dma_semaphore, #tpu.memory_space<semaphore_mem>> -> memref<!tpu.dma_semaphore, #tpu.memory_space<semaphore_mem>>
    tpu.enqueue_dma source(%8 : memref<512x128xbf16, #tpu.memory_space<any>>) target(%9 : memref<512x128xbf16, #tpu.memory_space<vmem>>) target_semaphore(%11 : memref<!tpu.dma_semaphore, #tpu.memory_space<semaphore_mem>>)
    %c3_i32 = arith.constant 3 : i32
    %c2048_i32 = arith.constant 2048 : i32
    %c0_i32_10 = arith.constant 0 : i32
    %12 = tpu.memref_slice %arg6[%c2048_i32, %c0_i32_10] : memref<2560x128xbf16, #tpu.memory_space<any>> -> memref<512x128xbf16, #tpu.memory_space<any>>
    %c2048_i32_11 = arith.constant 2048 : i32
    %c0_i32_12 = arith.constant 0 : i32
    %13 = tpu.memref_slice %arg9[%c2048_i32_11, %c0_i32_12] : memref<2560x128xbf16, #tpu.memory_space<vmem>> -> memref<512x128xbf16, #tpu.memory_space<vmem>>
    %14 = tpu.memref_slice %arg10[%c3_i32] : memref<4x!tpu.dma_semaphore, #tpu.memory_space<semaphore_mem>> -> memref<1x!tpu.dma_semaphore, #tpu.memory_space<semaphore_mem>>
    %15 = tpu.memref_squeeze %14 : memref<1x!tpu.dma_semaphore, #tpu.memory_space<semaphore_mem>> -> memref<!tpu.dma_semaphore, #tpu.memory_space<semaphore_mem>>
    tpu.enqueue_dma source(%12 : memref<512x128xbf16, #tpu.memory_space<any>>) target(%13 : memref<512x128xbf16, #tpu.memory_space<vmem>>) target_semaphore(%15 : memref<!tpu.dma_semaphore, #tpu.memory_space<semaphore_mem>>)
    %c0 = arith.constant 0 : index
    %c0_13 = arith.constant 0 : index
    %16 = vector.load %arg2[%c0, %c0_13] : memref<30x128xf32, #tpu.memory_space<vmem>>, vector<30x128xf32>
    %c0_14 = arith.constant 0 : index
    %c0_15 = arith.constant 0 : index
    %17 = vector.load %arg1[%c0_14, %c0_15] : memref<30x1xf32, #tpu.memory_space<vmem>>, vector<30x1xf32>
    %18 = vector.broadcast %17 : vector<30x1xf32> to vector<30x128xf32>
    %19 = arith.mulf %16, %18 : vector<30x128xf32>
    %20 = arith.truncf %19 : vector<30x128xf32> to vector<30x128xbf16>
    %c0_16 = arith.constant 0 : index
    %c0_17 = arith.constant 0 : index
    %21 = vector.load %arg3[%c0_16, %c0_17] : memref<272x128xbf16, #tpu.memory_space<vmem>>, vector<128x128xbf16>
    %cst = arith.constant dense<0.000000e+00> : vector<30x128xf32>
    %22 = tpu.matmul %20, %21, %cst {dimension_numbers = #tpu.dot_dimension_numbers<[1], [0], [0], [1], [0, 0, 1, 1], [], []>} : vector<30x128xbf16>, vector<128x128xbf16>, vector<30x128xf32> -> vector<30x128xf32>
    %c0_18 = arith.constant 0 : index
    %c0_19 = arith.constant 0 : index
    %23 = vector.load %arg5[%c0_18, %c0_19] : memref<8x128xf32, #tpu.memory_space<vmem>>, vector<1x128xf32>
    %24 = vector.broadcast %23 : vector<1x128xf32> to vector<30x128xf32>
    %25 = arith.addf %22, %24 : vector<30x128xf32>
    %cst_20 = arith.constant 0.000000e+00 : f32
    %26 = vector.broadcast %cst_20 : f32 to vector<30x128xf32>
    %27 = arith.maximumf %25, %26 : vector<30x128xf32>
    %cst_21 = arith.constant 0.000000e+00 : f32
    %28 = vector.broadcast %cst_21 : f32 to vector<30x128xf32>
    %29 = arith.subf %28, %25 : vector<30x128xf32>
    %cst_22 = arith.constant 0.000000e+00 : f32
    %30 = vector.broadcast %cst_22 : f32 to vector<30x128xf32>
    %31 = arith.maximumf %29, %30 : vector<30x128xf32>
    %32 = tpu.concatenate %27, %31 in 1 : vector<30x128xf32>, vector<30x128xf32> -> vector<30x256xf32>
    %33 = arith.truncf %32 : vector<30x256xf32> to vector<30x256xbf16>
    %c0_23 = arith.constant 0 : index
    %c0_24 = arith.constant 0 : index
    %34 = vector.load %arg4[%c0_23, %c0_24] : memref<256x512xbf16, #tpu.memory_space<vmem>>, vector<256x512xbf16>
    %cst_25 = arith.constant dense<0.000000e+00> : vector<30x512xf32>
    %35 = tpu.matmul %33, %34, %cst_25 {dimension_numbers = #tpu.dot_dimension_numbers<[1], [0], [0], [1], [0, 0, 1, 1], [], []>} : vector<30x256xbf16>, vector<256x512xbf16>, vector<30x512xf32> -> vector<30x512xf32>
    %36 = arith.truncf %35 : vector<30x512xf32> to vector<30x512xbf16>
    %c128 = arith.constant 128 : index
    %c0_26 = arith.constant 0 : index
    %37 = vector.load %arg3[%c128, %c0_26] : memref<272x128xbf16, #tpu.memory_space<vmem>>, vector<32x30xbf16>
    %38 = vector.extract_strided_slice %36 {offsets = [0, 0], sizes = [30, 128], strides = [1, 1]} : vector<30x512xbf16> to vector<30x128xbf16>
    %cst_27 = arith.constant dense<0.000000e+00> : vector<32x128xf32>
    %39 = tpu.matmul %37, %38, %cst_27 {dimension_numbers = #tpu.dot_dimension_numbers<[1], [0], [0], [1], [0, 0, 1, 1], [], []>} : vector<32x30xbf16>, vector<30x128xbf16>, vector<32x128xf32> -> vector<32x128xf32>
    %c160 = arith.constant 160 : index
    %c0_28 = arith.constant 0 : index
    %40 = vector.load %arg3[%c160, %c0_28] : memref<272x128xbf16, #tpu.memory_space<vmem>>, vector<32x30xbf16>
    %41 = vector.extract_strided_slice %36 {offsets = [0, 128], sizes = [30, 128], strides = [1, 1]} : vector<30x512xbf16> to vector<30x128xbf16>
    %cst_29 = arith.constant dense<0.000000e+00> : vector<32x128xf32>
    %42 = tpu.matmul %40, %41, %cst_29 {dimension_numbers = #tpu.dot_dimension_numbers<[1], [0], [0], [1], [0, 0, 1, 1], [], []>} : vector<32x30xbf16>, vector<30x128xbf16>, vector<32x128xf32> -> vector<32x128xf32>
    %43 = arith.addf %39, %42 : vector<32x128xf32>
    %c1 = arith.constant 1 : index
    %c0_30 = arith.constant 0 : index
    %44 = vector.load %arg5[%c1, %c0_30] : memref<8x128xf32, #tpu.memory_space<vmem>>, vector<1x128xf32>
    %45 = vector.broadcast %44 : vector<1x128xf32> to vector<32x128xf32>
    %46 = arith.addf %43, %45 : vector<32x128xf32>
    %c192 = arith.constant 192 : index
    %c0_31 = arith.constant 0 : index
    %47 = vector.load %arg3[%c192, %c0_31] : memref<272x128xbf16, #tpu.memory_space<vmem>>, vector<32x30xbf16>
    %48 = vector.extract_strided_slice %36 {offsets = [0, 256], sizes = [30, 128], strides = [1, 1]} : vector<30x512xbf16> to vector<30x128xbf16>
    %cst_32 = arith.constant dense<0.000000e+00> : vector<32x128xf32>
    %49 = tpu.matmul %47, %48, %cst_32 {dimension_numbers = #tpu.dot_dimension_numbers<[1], [0], [0], [1], [0, 0, 1, 1], [], []>} : vector<32x30xbf16>, vector<30x128xbf16>, vector<32x128xf32> -> vector<32x128xf32>
    %c224 = arith.constant 224 : index
    %c0_33 = arith.constant 0 : index
    %50 = vector.load %arg3[%c224, %c0_33] : memref<272x128xbf16, #tpu.memory_space<vmem>>, vector<32x30xbf16>
    %51 = vector.extract_strided_slice %36 {offsets = [0, 384], sizes = [30, 128], strides = [1, 1]} : vector<30x512xbf16> to vector<30x128xbf16>
    %cst_34 = arith.constant dense<0.000000e+00> : vector<32x128xf32>
    %52 = tpu.matmul %50, %51, %cst_34 {dimension_numbers = #tpu.dot_dimension_numbers<[1], [0], [0], [1], [0, 0, 1, 1], [], []>} : vector<32x30xbf16>, vector<30x128xbf16>, vector<32x128xf32> -> vector<32x128xf32>
    %53 = arith.addf %49, %52 : vector<32x128xf32>
    %c2 = arith.constant 2 : index
    %c0_35 = arith.constant 0 : index
    %54 = vector.load %arg5[%c2, %c0_35] : memref<8x128xf32, #tpu.memory_space<vmem>>, vector<1x128xf32>
    %55 = vector.broadcast %54 : vector<1x128xf32> to vector<32x128xf32>
    %56 = arith.addf %53, %55 : vector<32x128xf32>
    %57 = tpu.concatenate %46, %56 in 1 : vector<32x128xf32>, vector<32x128xf32> -> vector<32x256xf32>
    %c0_i32_36 = arith.constant 0 : i32
    %c0_i32_37 = arith.constant 0 : i32
    %c0_i32_38 = arith.constant 0 : i32
    %58 = tpu.memref_slice %arg6[%c0_i32_37, %c0_i32_38] : memref<2560x128xbf16, #tpu.memory_space<any>> -> memref<1024x128xbf16, #tpu.memory_space<any>>
    %c0_i32_39 = arith.constant 0 : i32
    %c0_i32_40 = arith.constant 0 : i32
    %59 = tpu.memref_slice %arg9[%c0_i32_39, %c0_i32_40] : memref<2560x128xbf16, #tpu.memory_space<vmem>> -> memref<1024x128xbf16, #tpu.memory_space<vmem>>
    %60 = tpu.memref_slice %arg10[%c0_i32_36] : memref<4x!tpu.dma_semaphore, #tpu.memory_space<semaphore_mem>> -> memref<1x!tpu.dma_semaphore, #tpu.memory_space<semaphore_mem>>
    %61 = tpu.memref_squeeze %60 : memref<1x!tpu.dma_semaphore, #tpu.memory_space<semaphore_mem>> -> memref<!tpu.dma_semaphore, #tpu.memory_space<semaphore_mem>>
    tpu.wait_dma2 semaphore(%61 : memref<!tpu.dma_semaphore, #tpu.memory_space<semaphore_mem>>) src(%58 : memref<1024x128xbf16, #tpu.memory_space<any>>) dst(%59 : memref<1024x128xbf16, #tpu.memory_space<vmem>>)
    %62 = vector.extract_strided_slice %57 {offsets = [0, 0], sizes = [16, 256], strides = [1, 1]} : vector<32x256xf32> to vector<16x256xf32>
    %63 = vector.extract_strided_slice %57 {offsets = [16, 0], sizes = [16, 256], strides = [1, 1]} : vector<32x256xf32> to vector<16x256xf32>
    %cst_41 = arith.constant 0.000000e+00 : f32
    %64 = vector.broadcast %cst_41 : f32 to vector<16x256xf32>
    %65 = arith.maximumf %62, %64 : vector<16x256xf32>
    %cst_42 = arith.constant 0.000000e+00 : f32
    %66 = vector.broadcast %cst_42 : f32 to vector<16x256xf32>
    %67 = arith.subf %66, %62 : vector<16x256xf32>
    %cst_43 = arith.constant 0.000000e+00 : f32
    %68 = vector.broadcast %cst_43 : f32 to vector<16x256xf32>
    %69 = arith.maximumf %67, %68 : vector<16x256xf32>
    %cst_44 = arith.constant 0.000000e+00 : f32
    %70 = vector.broadcast %cst_44 : f32 to vector<16x256xf32>
    %71 = arith.maximumf %63, %70 : vector<16x256xf32>
    %cst_45 = arith.constant 0.000000e+00 : f32
    %72 = vector.broadcast %cst_45 : f32 to vector<16x256xf32>
    %73 = arith.subf %72, %63 : vector<16x256xf32>
    %cst_46 = arith.constant 0.000000e+00 : f32
    %74 = vector.broadcast %cst_46 : f32 to vector<16x256xf32>
    %75 = arith.maximumf %73, %74 : vector<16x256xf32>
    %76 = tpu.concatenate %65, %69, %71, %75 in 1 : vector<16x256xf32>, vector<16x256xf32>, vector<16x256xf32>, vector<16x256xf32> -> vector<16x1024xf32>
    %77 = arith.truncf %76 : vector<16x1024xf32> to vector<16x1024xbf16>
    %c0_47 = arith.constant 0 : index
    %c0_48 = arith.constant 0 : index
    %78 = vector.load %arg9[%c0_47, %c0_48] : memref<2560x128xbf16, #tpu.memory_space<vmem>>, vector<1024x128xbf16>
    %cst_49 = arith.constant dense<0.000000e+00> : vector<16x128xf32>
    %79 = tpu.matmul %77, %78, %cst_49 {dimension_numbers = #tpu.dot_dimension_numbers<[1], [0], [0], [1], [0, 0, 1, 1], [], []>} : vector<16x1024xbf16>, vector<1024x128xbf16>, vector<16x128xf32> -> vector<16x128xf32>
    %c3 = arith.constant 3 : index
    %c0_50 = arith.constant 0 : index
    %80 = vector.load %arg5[%c3, %c0_50] : memref<8x128xf32, #tpu.memory_space<vmem>>, vector<1x128xf32>
    %81 = vector.broadcast %80 : vector<1x128xf32> to vector<16x128xf32>
    %82 = arith.addf %79, %81 : vector<16x128xf32>
    %c256 = arith.constant 256 : index
    %c0_51 = arith.constant 0 : index
    %83 = vector.load %arg3[%c256, %c0_51] : memref<272x128xbf16, #tpu.memory_space<vmem>>, vector<16x16xbf16>
    %84 = arith.truncf %82 : vector<16x128xf32> to vector<16x128xbf16>
    %cst_52 = arith.constant dense<0.000000e+00> : vector<16x128xf32>
    %85 = tpu.matmul %83, %84, %cst_52 {dimension_numbers = #tpu.dot_dimension_numbers<[1], [0], [0], [1], [0, 0, 1, 1], [], []>} : vector<16x16xbf16>, vector<16x128xbf16>, vector<16x128xf32> -> vector<16x128xf32>
    %cst_53 = arith.constant 0.000000e+00 : f32
    %86 = vector.broadcast %cst_53 : f32 to vector<16x128xf32>
    %87 = arith.maximumf %85, %86 : vector<16x128xf32>
    %cst_54 = arith.constant 0.000000e+00 : f32
    %88 = vector.broadcast %cst_54 : f32 to vector<16x128xf32>
    %89 = arith.subf %88, %85 : vector<16x128xf32>
    %cst_55 = arith.constant 0.000000e+00 : f32
    %90 = vector.broadcast %cst_55 : f32 to vector<16x128xf32>
    %91 = arith.maximumf %89, %90 : vector<16x128xf32>
    %92 = tpu.concatenate %87, %91 in 1 : vector<16x128xf32>, vector<16x128xf32> -> vector<16x256xf32>
    %c0_56 = arith.constant 0 : index
    %c0_57 = arith.constant 0 : index
    %93 = vector.load %arg8[%c0_56, %c0_57] : memref<16x256xf32, #tpu.memory_space<vmem>>, vector<16x256xf32>
    tpu.vector_store %arg8[%c0_56, %c0_57], %92 {strides = array<i32>} : memref<16x256xf32, #tpu.memory_space<vmem>>, vector<16x256xf32>,
    %c1_i32_58 = arith.constant 1 : i32
    %c1024_i32_59 = arith.constant 1024 : i32
    %c0_i32_60 = arith.constant 0 : i32
    %94 = tpu.memref_slice %arg6[%c1024_i32_59, %c0_i32_60] : memref<2560x128xbf16, #tpu.memory_space<any>> -> memref<512x128xbf16, #tpu.memory_space<any>>
    %c1024_i32_61 = arith.constant 1024 : i32
    %c0_i32_62 = arith.constant 0 : i32
    %95 = tpu.memref_slice %arg9[%c1024_i32_61, %c0_i32_62] : memref<2560x128xbf16, #tpu.memory_space<vmem>> -> memref<512x128xbf16, #tpu.memory_space<vmem>>
    %96 = tpu.memref_slice %arg10[%c1_i32_58] : memref<4x!tpu.dma_semaphore, #tpu.memory_space<semaphore_mem>> -> memref<1x!tpu.dma_semaphore, #tpu.memory_space<semaphore_mem>>
    %97 = tpu.memref_squeeze %96 : memref<1x!tpu.dma_semaphore, #tpu.memory_space<semaphore_mem>> -> memref<!tpu.dma_semaphore, #tpu.memory_space<semaphore_mem>>
    tpu.wait_dma2 semaphore(%97 : memref<!tpu.dma_semaphore, #tpu.memory_space<semaphore_mem>>) src(%94 : memref<512x128xbf16, #tpu.memory_space<any>>) dst(%95 : memref<512x128xbf16, #tpu.memory_space<vmem>>)
    %98 = vector.extract_strided_slice %82 {offsets = [0, 0], sizes = [8, 128], strides = [1, 1]} : vector<16x128xf32> to vector<8x128xf32>
    %99 = vector.extract_strided_slice %82 {offsets = [8, 0], sizes = [8, 128], strides = [1, 1]} : vector<16x128xf32> to vector<8x128xf32>
    %cst_63 = arith.constant 0.000000e+00 : f32
    %100 = vector.broadcast %cst_63 : f32 to vector<8x128xf32>
    %101 = arith.maximumf %98, %100 : vector<8x128xf32>
    %cst_64 = arith.constant 0.000000e+00 : f32
    %102 = vector.broadcast %cst_64 : f32 to vector<8x128xf32>
    %103 = arith.subf %102, %98 : vector<8x128xf32>
    %cst_65 = arith.constant 0.000000e+00 : f32
    %104 = vector.broadcast %cst_65 : f32 to vector<8x128xf32>
    %105 = arith.maximumf %103, %104 : vector<8x128xf32>
    %cst_66 = arith.constant 0.000000e+00 : f32
    %106 = vector.broadcast %cst_66 : f32 to vector<8x128xf32>
    %107 = arith.maximumf %99, %106 : vector<8x128xf32>
    %cst_67 = arith.constant 0.000000e+00 : f32
    %108 = vector.broadcast %cst_67 : f32 to vector<8x128xf32>
    %109 = arith.subf %108, %99 : vector<8x128xf32>
    %cst_68 = arith.constant 0.000000e+00 : f32
    %110 = vector.broadcast %cst_68 : f32 to vector<8x128xf32>
    %111 = arith.maximumf %109, %110 : vector<8x128xf32>
    %112 = tpu.concatenate %101, %105, %107, %111 in 1 : vector<8x128xf32>, vector<8x128xf32>, vector<8x128xf32>, vector<8x128xf32> -> vector<8x512xf32>
    %113 = arith.truncf %112 : vector<8x512xf32> to vector<8x512xbf16>
    %c1024 = arith.constant 1024 : index
    %c0_69 = arith.constant 0 : index
    %114 = vector.load %arg9[%c1024, %c0_69] : memref<2560x128xbf16, #tpu.memory_space<vmem>>, vector<512x128xbf16>
    %cst_70 = arith.constant dense<0.000000e+00> : vector<8x128xf32>
    %115 = tpu.matmul %113, %114, %cst_70 {dimension_numbers = #tpu.dot_dimension_numbers<[1], [0], [0], [1], [0, 0, 1, 1], [], []>} : vector<8x512xbf16>, vector<512x128xbf16>, vector<8x128xf32> -> vector<8x128xf32>
    %c4 = arith.constant 4 : index
    %c0_71 = arith.constant 0 : index
    %116 = vector.load %arg5[%c4, %c0_71] : memref<8x128xf32, #tpu.memory_space<vmem>>, vector<1x128xf32>
    %117 = vector.broadcast %116 : vector<1x128xf32> to vector<8x128xf32>
    %118 = arith.addf %115, %117 : vector<8x128xf32>
    %c2_i32_72 = arith.constant 2 : i32
    %c1536_i32_73 = arith.constant 1536 : i32
    %c0_i32_74 = arith.constant 0 : i32
    %119 = tpu.memref_slice %arg6[%c1536_i32_73, %c0_i32_74] : memref<2560x128xbf16, #tpu.memory_space<any>> -> memref<512x128xbf16, #tpu.memory_space<any>>
    %c1536_i32_75 = arith.constant 1536 : i32
    %c0_i32_76 = arith.constant 0 : i32
    %120 = tpu.memref_slice %arg9[%c1536_i32_75, %c0_i32_76] : memref<2560x128xbf16, #tpu.memory_space<vmem>> -> memref<512x128xbf16, #tpu.memory_space<vmem>>
    %121 = tpu.memref_slice %arg10[%c2_i32_72] : memref<4x!tpu.dma_semaphore, #tpu.memory_space<semaphore_mem>> -> memref<1x!tpu.dma_semaphore, #tpu.memory_space<semaphore_mem>>
    %122 = tpu.memref_squeeze %121 : memref<1x!tpu.dma_semaphore, #tpu.memory_space<semaphore_mem>> -> memref<!tpu.dma_semaphore, #tpu.memory_space<semaphore_mem>>
    tpu.wait_dma2 semaphore(%122 : memref<!tpu.dma_semaphore, #tpu.memory_space<semaphore_mem>>) src(%119 : memref<512x128xbf16, #tpu.memory_space<any>>) dst(%120 : memref<512x128xbf16, #tpu.memory_space<vmem>>)
    %123 = vector.extract_strided_slice %118 {offsets = [0, 0], sizes = [4, 128], strides = [1, 1]} : vector<8x128xf32> to vector<4x128xf32>
    %124 = vector.extract_strided_slice %118 {offsets = [4, 0], sizes = [4, 128], strides = [1, 1]} : vector<8x128xf32> to vector<4x128xf32>
    %cst_77 = arith.constant 0.000000e+00 : f32
    %125 = vector.broadcast %cst_77 : f32 to vector<4x128xf32>
    %126 = arith.maximumf %123, %125 : vector<4x128xf32>
    %cst_78 = arith.constant 0.000000e+00 : f32
    %127 = vector.broadcast %cst_78 : f32 to vector<4x128xf32>
    %128 = arith.subf %127, %123 : vector<4x128xf32>
    %cst_79 = arith.constant 0.000000e+00 : f32
    %129 = vector.broadcast %cst_79 : f32 to vector<4x128xf32>
    %130 = arith.maximumf %128, %129 : vector<4x128xf32>
    %cst_80 = arith.constant 0.000000e+00 : f32
    %131 = vector.broadcast %cst_80 : f32 to vector<4x128xf32>
    %132 = arith.maximumf %124, %131 : vector<4x128xf32>
    %cst_81 = arith.constant 0.000000e+00 : f32
    %133 = vector.broadcast %cst_81 : f32 to vector<4x128xf32>
    %134 = arith.subf %133, %124 : vector<4x128xf32>
    %cst_82 = arith.constant 0.000000e+00 : f32
    %135 = vector.broadcast %cst_82 : f32 to vector<4x128xf32>
    %136 = arith.maximumf %134, %135 : vector<4x128xf32>
    %137 = tpu.concatenate %126, %130, %132, %136 in 1 : vector<4x128xf32>, vector<4x128xf32>, vector<4x128xf32>, vector<4x128xf32> -> vector<4x512xf32>
    %138 = arith.truncf %137 : vector<4x512xf32> to vector<4x512xbf16>
    %c1536 = arith.constant 1536 : index
    %c0_83 = arith.constant 0 : index
    %139 = vector.load %arg9[%c1536, %c0_83] : memref<2560x128xbf16, #tpu.memory_space<vmem>>, vector<512x128xbf16>
    %cst_84 = arith.constant dense<0.000000e+00> : vector<4x128xf32>
    %140 = tpu.matmul %138, %139, %cst_84 {dimension_numbers = #tpu.dot_dimension_numbers<[1], [0], [0], [1], [0, 0, 1, 1], [], []>} : vector<4x512xbf16>, vector<512x128xbf16>, vector<4x128xf32> -> vector<4x128xf32>
    %c5 = arith.constant 5 : index
    %c0_85 = arith.constant 0 : index
    %141 = vector.load %arg5[%c5, %c0_85] : memref<8x128xf32, #tpu.memory_space<vmem>>, vector<1x128xf32>
    %142 = vector.broadcast %141 : vector<1x128xf32> to vector<4x128xf32>
    %143 = arith.addf %140, %142 : vector<4x128xf32>
    %c3_i32_86 = arith.constant 3 : i32
    %c2048_i32_87 = arith.constant 2048 : i32
    %c0_i32_88 = arith.constant 0 : i32
    %144 = tpu.memref_slice %arg6[%c2048_i32_87, %c0_i32_88] : memref<2560x128xbf16, #tpu.memory_space<any>> -> memref<512x128xbf16, #tpu.memory_space<any>>
    %c2048_i32_89 = arith.constant 2048 : i32
    %c0_i32_90 = arith.constant 0 : i32
    %145 = tpu.memref_slice %arg9[%c2048_i32_89, %c0_i32_90] : memref<2560x128xbf16, #tpu.memory_space<vmem>> -> memref<512x128xbf16, #tpu.memory_space<vmem>>
    %146 = tpu.memref_slice %arg10[%c3_i32_86] : memref<4x!tpu.dma_semaphore, #tpu.memory_space<semaphore_mem>> -> memref<1x!tpu.dma_semaphore, #tpu.memory_space<semaphore_mem>>
    %147 = tpu.memref_squeeze %146 : memref<1x!tpu.dma_semaphore, #tpu.memory_space<semaphore_mem>> -> memref<!tpu.dma_semaphore, #tpu.memory_space<semaphore_mem>>
    tpu.wait_dma2 semaphore(%147 : memref<!tpu.dma_semaphore, #tpu.memory_space<semaphore_mem>>) src(%144 : memref<512x128xbf16, #tpu.memory_space<any>>) dst(%145 : memref<512x128xbf16, #tpu.memory_space<vmem>>)
    %148 = vector.extract_strided_slice %143 {offsets = [0, 0], sizes = [2, 128], strides = [1, 1]} : vector<4x128xf32> to vector<2x128xf32>
    %149 = vector.extract_strided_slice %143 {offsets = [2, 0], sizes = [2, 128], strides = [1, 1]} : vector<4x128xf32> to vector<2x128xf32>
    %cst_91 = arith.constant 0.000000e+00 : f32
    %150 = vector.broadcast %cst_91 : f32 to vector<2x128xf32>
    %151 = arith.maximumf %148, %150 : vector<2x128xf32>
    %cst_92 = arith.constant 0.000000e+00 : f32
    %152 = vector.broadcast %cst_92 : f32 to vector<2x128xf32>
    %153 = arith.subf %152, %148 : vector<2x128xf32>
    %cst_93 = arith.constant 0.000000e+00 : f32
    %154 = vector.broadcast %cst_93 : f32 to vector<2x128xf32>
    %155 = arith.maximumf %153, %154 : vector<2x128xf32>
    %cst_94 = arith.constant 0.000000e+00 : f32
    %156 = vector.broadcast %cst_94 : f32 to vector<2x128xf32>
    %157 = arith.maximumf %149, %156 : vector<2x128xf32>
    %cst_95 = arith.constant 0.000000e+00 : f32
    %158 = vector.broadcast %cst_95 : f32 to vector<2x128xf32>
    %159 = arith.subf %158, %149 : vector<2x128xf32>
    %cst_96 = arith.constant 0.000000e+00 : f32
    %160 = vector.broadcast %cst_96 : f32 to vector<2x128xf32>
    %161 = arith.maximumf %159, %160 : vector<2x128xf32>
    %162 = tpu.concatenate %151, %155, %157, %161 in 1 : vector<2x128xf32>, vector<2x128xf32>, vector<2x128xf32>, vector<2x128xf32> -> vector<2x512xf32>
    %163 = arith.truncf %162 : vector<2x512xf32> to vector<2x512xbf16>
    %c2048 = arith.constant 2048 : index
    %c0_97 = arith.constant 0 : index
    %164 = vector.load %arg9[%c2048, %c0_97] : memref<2560x128xbf16, #tpu.memory_space<vmem>>, vector<512x128xbf16>
    %cst_98 = arith.constant dense<0.000000e+00> : vector<2x128xf32>
    %165 = tpu.matmul %163, %164, %cst_98 {dimension_numbers = #tpu.dot_dimension_numbers<[1], [0], [0], [1], [0, 0, 1, 1], [], []>} : vector<2x512xbf16>, vector<512x128xbf16>, vector<2x128xf32> -> vector<2x128xf32>
    %c6 = arith.constant 6 : index
    %c0_99 = arith.constant 0 : index
    %166 = vector.load %arg5[%c6, %c0_99] : memref<8x128xf32, #tpu.memory_space<vmem>>, vector<1x128xf32>
    %167 = vector.broadcast %166 : vector<1x128xf32> to vector<2x128xf32>
    %168 = arith.addf %165, %167 : vector<2x128xf32>
    %cst_100 = arith.constant 0.000000e+00 : f32
    %169 = vector.broadcast %cst_100 : f32 to vector<2x128xf32>
    %170 = arith.maximumf %168, %169 : vector<2x128xf32>
    %cst_101 = arith.constant 0.000000e+00 : f32
    %171 = vector.broadcast %cst_101 : f32 to vector<2x128xf32>
    %172 = arith.subf %171, %168 : vector<2x128xf32>
    %cst_102 = arith.constant 0.000000e+00 : f32
    %173 = vector.broadcast %cst_102 : f32 to vector<2x128xf32>
    %174 = arith.maximumf %172, %173 : vector<2x128xf32>
    %175 = tpu.concatenate %170, %174 in 1 : vector<2x128xf32>, vector<2x128xf32> -> vector<2x256xf32>
    %c0_103 = arith.constant 0 : index
    %c0_104 = arith.constant 0 : index
    %176 = vector.load %arg7[%c0_103, %c0_104] : memref<2x256xf32, #tpu.memory_space<vmem>>, vector<2x256xf32>
    tpu.vector_store %arg7[%c0_103, %c0_104], %175 {strides = array<i32>} : memref<2x256xf32, #tpu.memory_space<vmem>>, vector<2x256xf32>,
    return
  }
  func.func @transform_0(%arg0: i32) -> (i32, i32) {
    %c0_i32 = arith.constant 0 : i32
    %c0_i32_0 = arith.constant 0 : i32
    %c0_i32_1 = arith.constant 0 : i32
    return %c0_i32, %c0_i32_0 : i32, i32
  }
  func.func @transform_1(%arg0: i32) -> (i32, i32) {
    %c0_i32 = arith.constant 0 : i32
    %c0_i32_0 = arith.constant 0 : i32
    %c0_i32_1 = arith.constant 0 : i32
    return %c0_i32, %c0_i32_0 : i32, i32
  }
  func.func @transform_2(%arg0: i32) -> (i32, i32) {
    %c0_i32 = arith.constant 0 : i32
    %c0_i32_0 = arith.constant 0 : i32
    %c0_i32_1 = arith.constant 0 : i32
    return %c0_i32, %c0_i32_0 : i32, i32
  }
  func.func @transform_3(%arg0: i32) -> (i32, i32) {
    %c0_i32 = arith.constant 0 : i32
    %c0_i32_0 = arith.constant 0 : i32
    %c0_i32_1 = arith.constant 0 : i32
    return %c0_i32, %c0_i32_0 : i32, i32
  }
  func.func @transform_4(%arg0: i32) -> (i32, i32) {
    %c0_i32 = arith.constant 0 : i32
    %c0_i32_0 = arith.constant 0 : i32
    %c0_i32_1 = arith.constant 0 : i32
    return %c0_i32, %c0_i32_0 : i32, i32
  }
  func.func @transform_6(%arg0: i32) -> (i32, i32) {
    %c0_i32 = arith.constant 0 : i32
    %c0_i32_0 = arith.constant 0 : i32
    %c0_i32_1 = arith.constant 0 : i32
    return %c0_i32, %c0_i32_0 : i32, i32
  }
  func.func @transform_7(%arg0: i32) -> (i32, i32) {
    %c0_i32 = arith.constant 0 : i32
    %c0_i32_0 = arith.constant 0 : i32
    %c0_i32_1 = arith.constant 0 : i32
    return %c0_i32, %c0_i32_0 : i32, i32
  }
}

</mosaic_0001>

<bundles_post_ra>
// kernel: custom-call
= control target key start
LH: loop header
LB: loop body
LE: loop exit
PB: predicated region body
PF: predicated region fallthrough
CT: control target
= control target key end

     0   :  { %2 = vsyncpa [#allocation0], 0  ;;  %s61_s0 = inlined_call_operand.hbm [shape: c64[2,16,16], index: 0, kind: input, shape index: {}]   ;;  %s62_s1 = inlined_call_operand.vmem [shape: f32[2,16,16], index: 1, kind: output, shape index: {}]  }
   0x1   :  { %s3_s8 = sshll.u32 %s62_s1, 4  ;;  %s9_s11 = scalar_lea.hbm %s61_s0, 512  ;;  %s4_s8 = int_to_ptr.vmem [resolvable:$true] %s3_s8 }
   0x2   :  { %p10_p0 = scmp.ne.s32.totalorder %s61_s0, %s9_s11  ;;  %s11_s16 = scalar_lea.hbm %s61_s0, 1024 }
   0x3   :  { %p12_p1 = scmp.lt.u32.totalorder %s11_s16, %s9_s11  ;;  %p13_p2 = scmp.lt.u32.totalorder %s9_s11, %s61_s0 }
   0x5   :  { %p14_p3 = por %p13_p2, %p12_p1 }
   0x7   :  { %p15_p4 = pnand %p14_p3, %p10_p0 }
   0x9   :  { %18 = shalt.err (!%p15_p4)  }
   0xa   :  { %s19_s1 = scalar_lea.vmem %s4_s8, 512  ;;  %p24_p6 = scmp.lt.s32.totalorder %s4_s8, %s4_s8 }
   0xb   :  { %p20_p5 = scmp.ne.s32.totalorder %s4_s8, %s19_s1  ;;  %p25_p7 = scmp.lt.s32.totalorder %s19_s1, %s19_s1 }
   0xd   :  { %p26_p8 = por %p25_p7, %p24_p6 }
   0xf   :  { %p27_p9 = pnand %p26_p8, %p20_p5 }
  0x11   :  { %30 = shalt.err (!%p27_p9)  }
  0x12   :  { %6 = dma.hbm_to_vmem [thread:$0]  %s61_s0, 512, %s4_s8, [#allocation0] }
  0x13   :  { %31 = dma.done.wait [#allocation0], 512  }
  0x14   :  { %32 = vsyncadd [#allocation0], 4294966784 }
  0x15   :  { %8 = vsyncpa [#allocation0], 1 }

// kernel: custom-call.1
= control target key start
LH: loop header
LB: loop body
LE: loop exit
PB: predicated region body
PF: predicated region fallthrough
CT: control target
= control target key end

     0   :  { %s59_s0 = inlined_call_operand.hbm [shape: c64[2,16,16], index: 0, kind: input, shape index: {}]   ;;  %s60_s1 = inlined_call_operand.vmem [shape: f32[2,16,16], index: 1, kind: output, shape index: {}]  }
   0x1   :  { %s2_s8 = scalar_lea.hbm %s59_s0, 512 }
   0x2   :  { %3 = vsyncpa [#allocation0], 0  ;;  %s4_s11 = sshll.u32 %s60_s1, 4  ;;  %s34_s14 = scalar_lea.hbm %s59_s0, 1024  ;;  %s5_s11 = int_to_ptr.vmem [resolvable:$true] %s4_s11 }
   0x3   :  { %p11_p0 = scmp.ne.s32.totalorder %s2_s8, %s34_s14  ;;  %p13_p1 = scmp.lt.u32.totalorder %s2_s8, %s59_s0 }
   0x4   :  { %p14_p2 = scmp.lt.u32.totalorder %s34_s14, %s34_s14  ;;  %p16_p4 = scmp.lt.u32.totalorder %s34_s14, %s2_s8 }
   0x6   :  { %p15_p3 = por %p14_p2, %p13_p1 }
   0x8   :  { %p17_p5 = por %p16_p4, %p15_p3 }
   0xa   :  { %p18_p6 = pnand %p17_p5, %p11_p0 }
   0xc   :  { %21 = shalt.err (!%p18_p6)  }
   0xd   :  { %s22_s17 = scalar_lea.vmem %s5_s11, 512  ;;  %p27_p8 = scmp.lt.s32.totalorder %s5_s11, %s5_s11 }
   0xe   :  { %p23_p7 = scmp.ne.s32.totalorder %s5_s11, %s22_s17  ;;  %p28_p9 = scmp.lt.s32.totalorder %s22_s17, %s22_s17 }
  0x10   :  { %p29_p10 = por %p28_p9, %p27_p8 }
  0x12   :  { %p30_p11 = pnand %p29_p10, %p23_p7 }
  0x14   :  { %33 = shalt.err (!%p30_p11)  }
  0x15   :  { %7 = dma.hbm_to_vmem [thread:$0]  %s2_s8, 512, %s5_s11, [#allocation0] }
  0x16   :  { %35 = dma.done.wait [#allocation0], 512  }
  0x17   :  { %36 = vsyncadd [#allocation0], 4294966784 }
  0x18   :  { %9 = vsyncpa [#allocation0], 1 }

// kernel: tile.8
= control target key start
LH: loop header
LB: loop body
LE: loop exit
PB: predicated region body
PF: predicated region fallthrough
CT: control target
= control target key end

     0   :  { %s28_s0 = inlined_call_operand.vmem [shape: f32[2], index: 0, kind: input, shape index: {}]   ;;  %s29_s1 = inlined_call_operand.vmem [shape: f32[15,2], index: 1, kind: output, shape index: {}]  }
   0x1   :  { %v4_v0 = vld [vmem:[%s28_s0] ss:$0 sm:$0xff] }
   0x2   :  { %5 = vst [vmem:[%s29_s1] sm:$0xff] %v4_v0  ;;  %8 = vst [vmem:[%s29_s1 + $0x8] sm:$0xff] %v4_v0 }

// kernel: tile.0
= control target key start
LH: loop header
LB: loop body
LE: loop exit
PB: predicated region body
PF: predicated region fallthrough
CT: control target
= control target key end

     0   :  { %vm3_vm0 = vcmask 7168   ;;  %s29_s10 = smov 127   ;;  %s61_s0 = inlined_call_operand.vmem [shape: f32[15,2], index: 0, kind: input, shape index: {}]   ;;  %s62_s1 = inlined_call_operand.vmem [shape: f32[30,1], index: 1, kind: output, shape index: {}]  }
   0x1   :  { %v10_v0 = vld [vmem:[%s61_s0] sm:$0xff]   ;;  %v23_v1 = vld [vmem:[%s61_s0 + $0x8] sm:$0x7f]  }
   0x2   :  { %11 = vrot.lane.b32.xlu0 %v10_v0, %s29_s10  ;;  %4 = vst.msk [vmem:[%s62_s1] ss:$2 sm:$0xff] %vm3_vm0, %v10_v0   ;;  %24 = vst.msk [vmem:[%s62_s1 + $0x10] ss:$2 sm:$0x7f] %vm3_vm0, %v23_v1  }
   0x3   :  { %v26_v2 = vld [vmem:[%s61_s0 + $0x8] sm:$0x7f]  }
   0x6   :  { %18 = vrot.lane.b32.xlu0 %v26_v2, %s29_s10 }
  0x74   :  { %v12_v3 = vpop.permute.xlu0 %11  }
  0x75   :  { %25 = vst.msk [vmem:[%s62_s1 + $0x1] ss:$2 sm:$0xff] %vm3_vm0, %v12_v3  }
  0x78   :  { %v19_v4 = vpop.permute.xlu0 %18  }
  0x79   :  { %27 = vst.msk [vmem:[%s62_s1 + $0x11] ss:$2 sm:$0x7f] %vm3_vm0, %v19_v4  }

// kernel: encoder_24k_forward.1
= control target key start
LH: loop header
LB: loop body
LE: loop exit
PB: predicated region body
PF: predicated region fallthrough
CT: control target
= control target key end

     0   :  { %s4297_s0 = inlined_call_operand.vmem [shape: f32[30,1], index: 0, kind: input, shape index: {}]   ;;  %s4298_s1 = inlined_call_operand.vmem [shape: f32[30,128], index: 1, kind: input, shape index: {}]   ;;  %s4299_s2 = inlined_call_operand.vmem [shape: bf16[272,128], index: 2, kind: input, shape index: {}]   ;;  %s4300_s3 = inlined_call_operand.vmem [shape: bf16[256,512], index: 3, kind: input, shape index: {}]   ;;  %s4301_s4 = inlined_call_operand.vmem [shape: f32[8,128], index: 4, kind: input, shape index: {}]   ;;  %s4302_s5 = inlined_call_operand.vmem [shape: bf16[2560,128], index: 5, kind: input, shape index: {}]   ;;  %s4303_s6 = inlined_call_operand.vmem [shape: f32[2,256], index: 6, kind: output, shape index: {0}]   ;;  %s4304_s7 = inlined_call_operand.vmem [shape: f32[16,256], index: 7, kind: output, shape index: {1}]  }
   0x1   :  { %v2987_v0 = vld [vmem:[%s4302_s5] sm:$0xff]  ;;  %v2992_v1 = vld [vmem:[%s4302_s5 + $0x8] sm:$0xff]  ;;  %v2997_v2 = vld [vmem:[%s4302_s5 + $0x10] sm:$0xff] }
   0x2   :  { %v3002_v3 = vld [vmem:[%s4302_s5 + $0x18] sm:$0xff]  ;;  %v3007_v4 = vld [vmem:[%s4302_s5 + $0x20] sm:$0xff]  ;;  %v3012_v5 = vld [vmem:[%s4302_s5 + $0x28] sm:$0xff] }
   0x3   :  { %v3017_v6 = vld [vmem:[%s4302_s5 + $0x30] sm:$0xff]  ;;  %v3022_v7 = vld [vmem:[%s4302_s5 + $0x38] sm:$0xff]  ;;  %v3027_v8 = vld [vmem:[%s4302_s5 + $0x40] sm:$0xff] }
   0x4   :  { %v3032_v9 = vld [vmem:[%s4302_s5 + $0x48] sm:$0xff]  ;;  %v3037_v10 = vld [vmem:[%s4302_s5 + $0x50] sm:$0xff]  ;;  %v3042_v11 = vld [vmem:[%s4302_s5 + $0x58] sm:$0xff] }
   0x5   :  { %v3047_v12 = vld [vmem:[%s4302_s5 + $0x60] sm:$0xff]  ;;  %v3052_v13 = vld [vmem:[%s4302_s5 + $0x68] sm:$0xff]  ;;  %v3057_v14 = vld [vmem:[%s4302_s5 + $0x70] sm:$0xff] }
   0x6   :  { %v3062_v15 = vld [vmem:[%s4302_s5 + $0x78] sm:$0xff]  ;;  %v3067_v16 = vld [vmem:[%s4302_s5 + $0x80] sm:$0xff]  ;;  %v3072_v17 = vld [vmem:[%s4302_s5 + $0x88] sm:$0xff] }
   0x7   :  { %v3077_v18 = vld [vmem:[%s4302_s5 + $0x90] sm:$0xff]  ;;  %v3082_v19 = vld [vmem:[%s4302_s5 + $0x98] sm:$0xff]  ;;  %v3087_v20 = vld [vmem:[%s4302_s5 + $0xa0] sm:$0xff] }
   0x8   :  { %v3092_v21 = vld [vmem:[%s4302_s5 + $0xa8] sm:$0xff]  ;;  %v3097_v22 = vld [vmem:[%s4302_s5 + $0xb0] sm:$0xff]  ;;  %v3102_v23 = vld [vmem:[%s4302_s5 + $0xb8] sm:$0xff] }
   0x9   :  { %v3107_v24 = vld [vmem:[%s4302_s5 + $0xc0] sm:$0xff]  ;;  %v3112_v25 = vld [vmem:[%s4302_s5 + $0xc8] sm:$0xff]  ;;  %v3117_v26 = vld [vmem:[%s4302_s5 + $0xd0] sm:$0xff] }
   0xa   :  { %v3122_v27 = vld [vmem:[%s4302_s5 + $0xd8] sm:$0xff]  ;;  %v3127_v28 = vld [vmem:[%s4302_s5 + $0xe0] sm:$0xff]  ;;  %v3132_v29 = vld [vmem:[%s4302_s5 + $0xe8] sm:$0xff] }
   0xb   :  { %v3137_v30 = vld [vmem:[%s4302_s5 + $0xf0] sm:$0xff]  ;;  %v3142_v31 = vld [vmem:[%s4302_s5 + $0xf8] sm:$0xff]  ;;  %v3147_v32 = vld [vmem:[%s4302_s5 + $0x100] sm:$0xff] }
   0xc   :  { %v3152_v33 = vld [vmem:[%s4302_s5 + $0x108] sm:$0xff]  ;;  %v3157_v34 = vld [vmem:[%s4302_s5 + $0x110] sm:$0xff]  ;;  %v3162_v35 = vld [vmem:[%s4302_s5 + $0x118] sm:$0xff] }
   0xd   :  { %4305 = vst [vmem:[#allocation12_spill] sm:$0xff] %v3157_v34  ;;  %4306 = vst [vmem:[#allocation13_spill] sm:$0xff] %v3162_v35  ;;  %v3167_v36 = vld [vmem:[%s4302_s5 + $0x120] sm:$0xff]  ;;  %v3172_v37 = vld [vmem:[%s4302_s5 + $0x128] sm:$0xff] }
   0xe   :  { %4307 = vst [vmem:[#allocation14_spill] sm:$0xff] %v3167_v36  ;;  %4308 = vst [vmem:[#allocation15_spill] sm:$0xff] %v3172_v37  ;;  %v3177_v38 = vld [vmem:[%s4302_s5 + $0x130] sm:$0xff]  ;;  %v3182_v39 = vld [vmem:[%s4302_s5 + $0x138] sm:$0xff] }
   0xf   :  { %4309 = vst [vmem:[#allocation16_spill] sm:$0xff] %v3177_v38  ;;  %4310 = vst [vmem:[#allocation17_spill] sm:$0xff] %v3182_v39  ;;  %v3187_v40 = vld [vmem:[%s4302_s5 + $0x140] sm:$0xff]  ;;  %v3192_v41 = vld [vmem:[%s4302_s5 + $0x148] sm:$0xff] }
  0x10   :  { %v3197_v42 = vld [vmem:[%s4302_s5 + $0x150] sm:$0xff]  ;;  %v3202_v43 = vld [vmem:[%s4302_s5 + $0x158] sm:$0xff]  ;;  %v3207_v44 = vld [vmem:[%s4302_s5 + $0x160] sm:$0xff] }
  0x11   :  { %4311 = vst [vmem:[#allocation18_spill] sm:$0xff] %v3202_v43  ;;  %4312 = vst [vmem:[#allocation19_spill] sm:$0xff] %v3207_v44  ;;  %v3212_v45 = vld [vmem:[%s4302_s5 + $0x168] sm:$0xff]  ;;  %v3217_v46 = vld [vmem:[%s4302_s5 + $0x170] sm:$0xff] }
  0x12   :  { %4313 = vst [vmem:[#allocation20_spill] sm:$0xff] %v3212_v45  ;;  %4314 = vst [vmem:[#allocation21_spill] sm:$0xff] %v3217_v46  ;;  %v3222_v47 = vld [vmem:[%s4302_s5 + $0x178] sm:$0xff]  ;;  %v3227_v48 = vld [vmem:[%s4302_s5 + $0x180] sm:$0xff] }
  0x13   :  { %4315 = vst [vmem:[#allocation22_spill] sm:$0xff] %v3222_v47  ;;  %v3232_v49 = vld [vmem:[%s4302_s5 + $0x188] sm:$0xff]  ;;  %v3237_v50 = vld [vmem:[%s4302_s5 + $0x190] sm:$0xff]  ;;  %v3242_v51 = vld [vmem:[%s4302_s5 + $0x198] sm:$0xff] }
  0x14   :  { %4316 = vst [vmem:[#allocation23_spill] sm:$0xff] %v3237_v50  ;;  %4317 = vst [vmem:[#allocation24_spill] sm:$0xff] %v3242_v51  ;;  %v3247_v52 = vld [vmem:[%s4302_s5 + $0x1a0] sm:$0xff]  ;;  %v3252_v53 = vld [vmem:[%s4302_s5 + $0x1a8] sm:$0xff] }
  0x15   :  { %4318 = vst [vmem:[#allocation25_spill] sm:$0xff] %v3247_v52  ;;  %4319 = vst [vmem:[#allocation26_spill] sm:$0xff] %v3252_v53  ;;  %v3257_v54 = vld [vmem:[%s4302_s5 + $0x1b0] sm:$0xff]  ;;  %v3262_v55 = vld [vmem:[%s4302_s5 + $0x1b8] sm:$0xff] }
  0x16   :  { %4320 = vst [vmem:[#allocation27_spill] sm:$0xff] %v3257_v54  ;;  %4321 = vst [vmem:[#allocation28_spill] sm:$0xff] %v3262_v55  ;;  %v3267_v56 = vld [vmem:[%s4302_s5 + $0x1c0] sm:$0xff]  ;;  %v3272_v57 = vld [vmem:[%s4302_s5 + $0x1c8] sm:$0xff] }
  0x17   :  { %v3277_v58 = vld [vmem:[%s4302_s5 + $0x1d0] sm:$0xff]  ;;  %v3282_v59 = vld [vmem:[%s4302_s5 + $0x1d8] sm:$0xff]  ;;  %v3287_v60 = vld [vmem:[%s4302_s5 + $0x1e0] sm:$0xff] }
  0x18   :  { %4322 = vst [vmem:[#allocation29_spill] sm:$0xff] %v3277_v58  ;;  %4323 = vst [vmem:[#allocation30_spill] sm:$0xff] %v3282_v59  ;;  %v3292_v61 = vld [vmem:[%s4302_s5 + $0x1e8] sm:$0xff]  ;;  %v3297_v62 = vld [vmem:[%s4302_s5 + $0x1f0] sm:$0xff] }
  0x19   :  { %4324 = vst [vmem:[#allocation31_spill] sm:$0xff] %v3287_v60  ;;  %4325 = vst [vmem:[#allocation32_spill] sm:$0xff] %v3292_v61  ;;  %v3302_v63 = vld [vmem:[%s4302_s5 + $0x1f8] sm:$0xff] }
  0x1a   :  { %4326 = vst [vmem:[#allocation33_spill] sm:$0xff] %v3297_v62  ;;  %4327 = vst [vmem:[#allocation34_spill] sm:$0xff] %v3302_v63 }
  0x1b   :  { %191 = vsyncadd [#allocation3], 8192  ;;  %v3307_v55 = vld [vmem:[%s4302_s5 + $0x200] sm:$0xff]  ;;  %v3312_v39 = vld [vmem:[%s4302_s5 + $0x208] sm:$0xff] }
  0x1c   :  { %4328 = vst [vmem:[#allocation35_spill] sm:$0xff] %v3307_v55  ;;  %4329 = vst [vmem:[#allocation36_spill] sm:$0xff] %v3312_v39  ;;  %v3317_v47 = vld [vmem:[%s4302_s5 + $0x210] sm:$0xff]  ;;  %v3322_v63 = vld [vmem:[%s4302_s5 + $0x218] sm:$0xff] }
  0x1d   :  { %4330 = vst [vmem:[#allocation37_spill] sm:$0xff] %v3317_v47  ;;  %4331 = vst [vmem:[#allocation38_spill] sm:$0xff] %v3322_v63  ;;  %v3327_v54 = vld [vmem:[%s4302_s5 + $0x220] sm:$0xff]  ;;  %v3332_v55 = vld [vmem:[%s4302_s5 + $0x228] sm:$0xff] }
  0x1e   :  { %4332 = vst [vmem:[#allocation39_spill] sm:$0xff] %v3327_v54  ;;  %4333 = vst [vmem:[#allocation40_spill] sm:$0xff] %v3332_v55  ;;  %v3337_v39 = vld [vmem:[%s4302_s5 + $0x230] sm:$0xff]  ;;  %v3342_v47 = vld [vmem:[%s4302_s5 + $0x238] sm:$0xff] }
  0x1f   :  { %4334 = vst [vmem:[#allocation41_spill] sm:$0xff] %v3337_v39  ;;  %4335 = vst [vmem:[#allocation42_spill] sm:$0xff] %v3342_v47  ;;  %v3347_v63 = vld [vmem:[%s4302_s5 + $0x240] sm:$0xff]  ;;  %v3352_v54 = vld [vmem:[%s4302_s5 + $0x248] sm:$0xff] }
  0x20   :  { %4336 = vst [vmem:[#allocation43_spill] sm:$0xff] %v3347_v63  ;;  %4337 = vst [vmem:[#allocation44_spill] sm:$0xff] %v3352_v54  ;;  %v3357_v55 = vld [vmem:[%s4302_s5 + $0x250] sm:$0xff]  ;;  %v3362_v39 = vld [vmem:[%s4302_s5 + $0x258] sm:$0xff] }
  0x21   :  { %4338 = vst [vmem:[#allocation45_spill] sm:$0xff] %v3357_v55  ;;  %4339 = vst [vmem:[#allocation46_spill] sm:$0xff] %v3362_v39  ;;  %v3367_v47 = vld [vmem:[%s4302_s5 + $0x260] sm:$0xff]  ;;  %v3372_v63 = vld [vmem:[%s4302_s5 + $0x268] sm:$0xff] }
  0x22   :  { %4340 = vst [vmem:[#allocation47_spill] sm:$0xff] %v3367_v47  ;;  %4341 = vst [vmem:[#allocation48_spill] sm:$0xff] %v3372_v63  ;;  %v3377_v54 = vld [vmem:[%s4302_s5 + $0x270] sm:$0xff]  ;;  %v3382_v55 = vld [vmem:[%s4302_s5 + $0x278] sm:$0xff] }
  0x23   :  { %4342 = vst [vmem:[#allocation49_spill] sm:$0xff] %v3377_v54  ;;  %4343 = vst [vmem:[#allocation50_spill] sm:$0xff] %v3382_v55  ;;  %v3387_v39 = vld [vmem:[%s4302_s5 + $0x280] sm:$0xff]  ;;  %v3392_v47 = vld [vmem:[%s4302_s5 + $0x288] sm:$0xff] }
  0x24   :  { %4344 = vst [vmem:[#allocation51_spill] sm:$0xff] %v3387_v39  ;;  %4345 = vst [vmem:[#allocation52_spill] sm:$0xff] %v3392_v47  ;;  %v3397_v63 = vld [vmem:[%s4302_s5 + $0x290] sm:$0xff]  ;;  %v3402_v54 = vld [vmem:[%s4302_s5 + $0x298] sm:$0xff] }
  0x25   :  { %4346 = vst [vmem:[#allocation53_spill] sm:$0xff] %v3397_v63  ;;  %4347 = vst [vmem:[#allocation54_spill] sm:$0xff] %v3402_v54  ;;  %v3407_v55 = vld [vmem:[%s4302_s5 + $0x2a0] sm:$0xff]  ;;  %v3412_v39 = vld [vmem:[%s4302_s5 + $0x2a8] sm:$0xff] }
  0x26   :  { %4348 = vst [vmem:[#allocation55_spill] sm:$0xff] %v3407_v55  ;;  %4349 = vst [vmem:[#allocation56_spill] sm:$0xff] %v3412_v39  ;;  %v3417_v47 = vld [vmem:[%s4302_s5 + $0x2b0] sm:$0xff]  ;;  %v3422_v63 = vld [vmem:[%s4302_s5 + $0x2b8] sm:$0xff] }
  0x27   :  { %4350 = vst [vmem:[#allocation57_spill] sm:$0xff] %v3417_v47  ;;  %4351 = vst [vmem:[#allocation58_spill] sm:$0xff] %v3422_v63  ;;  %v3427_v54 = vld [vmem:[%s4302_s5 + $0x2c0] sm:$0xff]  ;;  %v3432_v55 = vld [vmem:[%s4302_s5 + $0x2c8] sm:$0xff] }
  0x28   :  { %4352 = vst [vmem:[#allocation59_spill] sm:$0xff] %v3427_v54  ;;  %4353 = vst [vmem:[#allocation60_spill] sm:$0xff] %v3432_v55  ;;  %v3437_v39 = vld [vmem:[%s4302_s5 + $0x2d0] sm:$0xff]  ;;  %v3442_v47 = vld [vmem:[%s4302_s5 + $0x2d8] sm:$0xff] }
  0x29   :  { %4354 = vst [vmem:[#allocation61_spill] sm:$0xff] %v3437_v39  ;;  %4355 = vst [vmem:[#allocation62_spill] sm:$0xff] %v3442_v47  ;;  %v3447_v63 = vld [vmem:[%s4302_s5 + $0x2e0] sm:$0xff]  ;;  %v3452_v54 = vld [vmem:[%s4302_s5 + $0x2e8] sm:$0xff] }
  0x2a   :  { %4356 = vst [vmem:[#allocation63_spill] sm:$0xff] %v3447_v63  ;;  %4357 = vst [vmem:[#allocation64_spill] sm:$0xff] %v3452_v54  ;;  %v3457_v55 = vld [vmem:[%s4302_s5 + $0x2f0] sm:$0xff]  ;;  %v3462_v39 = vld [vmem:[%s4302_s5 + $0x2f8] sm:$0xff] }
  0x2b   :  { %4358 = vst [vmem:[#allocation65_spill] sm:$0xff] %v3457_v55  ;;  %4359 = vst [vmem:[#allocation66_spill] sm:$0xff] %v3462_v39 }
  0x2c   :  { %298 = vsyncadd [#allocation3 + $0x1], 4096  ;;  %v3467_v63 = vld [vmem:[%s4302_s5 + $0x300] sm:$0xff]  ;;  %v3472_v54 = vld [vmem:[%s4302_s5 + $0x308] sm:$0xff] }
  0x2d   :  { %4360 = vst [vmem:[#allocation67_spill] sm:$0xff] %v3467_v63  ;;  %4361 = vst [vmem:[#allocation68_spill] sm:$0xff] %v3472_v54  ;;  %v3477_v55 = vld [vmem:[%s4302_s5 + $0x310] sm:$0xff]  ;;  %v3482_v39 = vld [vmem:[%s4302_s5 + $0x318] sm:$0xff] }
  0x2e   :  { %4362 = vst [vmem:[#allocation69_spill] sm:$0xff] %v3477_v55  ;;  %4363 = vst [vmem:[#allocation70_spill] sm:$0xff] %v3482_v39  ;;  %v3487_v47 = vld [vmem:[%s4302_s5 + $0x320] sm:$0xff]  ;;  %v3492_v63 = vld [vmem:[%s4302_s5 + $0x328] sm:$0xff] }
  0x2f   :  { %4364 = vst [vmem:[#allocation71_spill] sm:$0xff] %v3487_v47  ;;  %4365 = vst [vmem:[#allocation72_spill] sm:$0xff] %v3492_v63  ;;  %v3497_v54 = vld [vmem:[%s4302_s5 + $0x330] sm:$0xff]  ;;  %v3502_v55 = vld [vmem:[%s4302_s5 + $0x338] sm:$0xff] }
  0x30   :  { %4366 = vst [vmem:[#allocation73_spill] sm:$0xff] %v3497_v54  ;;  %4367 = vst [vmem:[#allocation74_spill] sm:$0xff] %v3502_v55  ;;  %v3507_v39 = vld [vmem:[%s4302_s5 + $0x340] sm:$0xff]  ;;  %v3512_v47 = vld [vmem:[%s4302_s5 + $0x348] sm:$0xff] }
  0x31   :  { %4368 = vst [vmem:[#allocation75_spill] sm:$0xff] %v3507_v39  ;;  %4369 = vst [vmem:[#allocation76_spill] sm:$0xff] %v3512_v47  ;;  %v3517_v63 = vld [vmem:[%s4302_s5 + $0x350] sm:$0xff]  ;;  %v3522_v54 = vld [vmem:[%s4302_s5 + $0x358] sm:$0xff] }
  0x32   :  { %4370 = vst [vmem:[#allocation77_spill] sm:$0xff] %v3517_v63  ;;  %4371 = vst [vmem:[#allocation78_spill] sm:$0xff] %v3522_v54  ;;  %v3527_v55 = vld [vmem:[%s4302_s5 + $0x360] sm:$0xff]  ;;  %v3532_v39 = vld [vmem:[%s4302_s5 + $0x368] sm:$0xff] }
  0x33   :  { %4372 = vst [vmem:[#allocation79_spill] sm:$0xff] %v3527_v55  ;;  %4373 = vst [vmem:[#allocation80_spill] sm:$0xff] %v3532_v39  ;;  %v3537_v47 = vld [vmem:[%s4302_s5 + $0x370] sm:$0xff]  ;;  %v3542_v63 = vld [vmem:[%s4302_s5 + $0x378] sm:$0xff] }
  0x34   :  { %4374 = vst [vmem:[#allocation81_spill] sm:$0xff] %v3537_v47  ;;  %4375 = vst [vmem:[#allocation82_spill] sm:$0xff] %v3542_v63  ;;  %v3547_v54 = vld [vmem:[%s4302_s5 + $0x380] sm:$0xff]  ;;  %v3552_v55 = vld [vmem:[%s4302_s5 + $0x388] sm:$0xff] }
  0x35   :  { %4376 = vst [vmem:[#allocation83_spill] sm:$0xff] %v3547_v54  ;;  %4377 = vst [vmem:[#allocation84_spill] sm:$0xff] %v3552_v55  ;;  %v3557_v39 = vld [vmem:[%s4302_s5 + $0x390] sm:$0xff]  ;;  %v3562_v47 = vld [vmem:[%s4302_s5 + $0x398] sm:$0xff] }
  0x36   :  { %4378 = vst [vmem:[#allocation85_spill] sm:$0xff] %v3557_v39  ;;  %4379 = vst [vmem:[#allocation86_spill] sm:$0xff] %v3562_v47  ;;  %v3567_v63 = vld [vmem:[%s4302_s5 + $0x3a0] sm:$0xff]  ;;  %v3572_v54 = vld [vmem:[%s4302_s5 + $0x3a8] sm:$0xff] }
  0x37   :  { %4380 = vst [vmem:[#allocation87_spill] sm:$0xff] %v3567_v63  ;;  %4381 = vst [vmem:[#allocation88_spill] sm:$0xff] %v3572_v54  ;;  %v3577_v55 = vld [vmem:[%s4302_s5 + $0x3b0] sm:$0xff]  ;;  %v3582_v39 = vld [vmem:[%s4302_s5 + $0x3b8] sm:$0xff] }
  0x38   :  { %4382 = vst [vmem:[#allocation89_spill] sm:$0xff] %v3577_v55  ;;  %4383 = vst [vmem:[#allocation90_spill] sm:$0xff] %v3582_v39  ;;  %v3587_v47 = vld [vmem:[%s4302_s5 + $0x3c0] sm:$0xff]  ;;  %v3592_v63 = vld [vmem:[%s4302_s5 + $0x3c8] sm:$0xff] }
  0x39   :  { %4384 = vst [vmem:[#allocation91_spill] sm:$0xff] %v3587_v47  ;;  %4385 = vst [vmem:[#allocation92_spill] sm:$0xff] %v3592_v63  ;;  %v3597_v54 = vld [vmem:[%s4302_s5 + $0x3d0] sm:$0xff]  ;;  %v3602_v55 = vld [vmem:[%s4302_s5 + $0x3d8] sm:$0xff] }
  0x3a   :  { %4386 = vst [vmem:[#allocation93_spill] sm:$0xff] %v3597_v54  ;;  %4387 = vst [vmem:[#allocation94_spill] sm:$0xff] %v3602_v55  ;;  %v3607_v39 = vld [vmem:[%s4302_s5 + $0x3e0] sm:$0xff]  ;;  %v3612_v47 = vld [vmem:[%s4302_s5 + $0x3e8] sm:$0xff] }
  0x3b   :  { %4388 = vst [vmem:[#allocation95_spill] sm:$0xff] %v3607_v39  ;;  %4389 = vst [vmem:[#allocation96_spill] sm:$0xff] %v3612_v47  ;;  %v3617_v63 = vld [vmem:[%s4302_s5 + $0x3f0] sm:$0xff]  ;;  %v3622_v54 = vld [vmem:[%s4302_s5 + $0x3f8] sm:$0xff] }
  0x3c   :  { %4390 = vst [vmem:[#allocation97_spill] sm:$0xff] %v3617_v63  ;;  %4391 = vst [vmem:[#allocation98_spill] sm:$0xff] %v3622_v54 }
  0x3d   :  { %405 = vsyncadd [#allocation3 + $0x2], 4096  ;;  %v3627_v39 = vld [vmem:[%s4302_s5 + $0x400] sm:$0xff]  ;;  %v3632_v47 = vld [vmem:[%s4302_s5 + $0x408] sm:$0xff]  ;;  %v2941_v38 = vmov 0  }
  0x3e   :  { %4392 = vst [vmem:[#allocation99_spill] sm:$0xff] %v3627_v39  ;;  %4393 = vst [vmem:[#allocation100_spill] sm:$0xff] %v3632_v47  ;;  %v3637_v63 = vld [vmem:[%s4302_s5 + $0x410] sm:$0xff]  ;;  %v3642_v54 = vld [vmem:[%s4302_s5 + $0x418] sm:$0xff]  ;;  %2819 = vset.pattern.permute.xlu1 %v2941_v38  ;;  %2818 = vset.pattern.permute.xlu0 %v2941_v38 }
  0x3f   :  { %4394 = vst [vmem:[#allocation101_spill] sm:$0xff] %v3637_v63  ;;  %4395 = vst [vmem:[#allocation102_spill] sm:$0xff] %v3642_v54  ;;  %v3647_v55 = vld [vmem:[%s4302_s5 + $0x420] sm:$0xff]  ;;  %v3652_v39 = vld [vmem:[%s4302_s5 + $0x428] sm:$0xff] }
  0x40   :  { %4396 = vst [vmem:[#allocation103_spill] sm:$0xff] %v3647_v55  ;;  %4397 = vst [vmem:[#allocation104_spill] sm:$0xff] %v3652_v39  ;;  %v3657_v47 = vld [vmem:[%s4302_s5 + $0x430] sm:$0xff]  ;;  %v3662_v63 = vld [vmem:[%s4302_s5 + $0x438] sm:$0xff] }
  0x41   :  { %4398 = vst [vmem:[#allocation105_spill] sm:$0xff] %v3657_v47  ;;  %4399 = vst [vmem:[#allocation106_spill] sm:$0xff] %v3662_v63  ;;  %v3667_v54 = vld [vmem:[%s4302_s5 + $0x440] sm:$0xff]  ;;  %v3672_v55 = vld [vmem:[%s4302_s5 + $0x448] sm:$0xff] }
  0x42   :  { %4400 = vst [vmem:[#allocation107_spill] sm:$0xff] %v3667_v54  ;;  %4401 = vst [vmem:[#allocation108_spill] sm:$0xff] %v3672_v55  ;;  %v3677_v39 = vld [vmem:[%s4302_s5 + $0x450] sm:$0xff]  ;;  %v3682_v47 = vld [vmem:[%s4302_s5 + $0x458] sm:$0xff] }
  0x43   :  { %4402 = vst [vmem:[#allocation109_spill] sm:$0xff] %v3677_v39  ;;  %4403 = vst [vmem:[#allocation110_spill] sm:$0xff] %v3682_v47  ;;  %v3687_v63 = vld [vmem:[%s4302_s5 + $0x460] sm:$0xff]  ;;  %v3692_v54 = vld [vmem:[%s4302_s5 + $0x468] sm:$0xff] }
  0x44   :  { %4404 = vst [vmem:[#allocation111_spill] sm:$0xff] %v3687_v63  ;;  %4405 = vst [vmem:[#allocation112_spill] sm:$0xff] %v3692_v54  ;;  %v3697_v55 = vld [vmem:[%s4302_s5 + $0x470] sm:$0xff]  ;;  %v3702_v39 = vld [vmem:[%s4302_s5 + $0x478] sm:$0xff] }
  0x45   :  { %4406 = vst [vmem:[#allocation113_spill] sm:$0xff] %v3697_v55  ;;  %4407 = vst [vmem:[#allocation114_spill] sm:$0xff] %v3702_v39  ;;  %v3707_v47 = vld [vmem:[%s4302_s5 + $0x480] sm:$0xff]  ;;  %v3712_v63 = vld [vmem:[%s4302_s5 + $0x488] sm:$0xff] }
  0x46   :  { %4408 = vst [vmem:[#allocation115_spill] sm:$0xff] %v3707_v47  ;;  %4409 = vst [vmem:[#allocation116_spill] sm:$0xff] %v3712_v63  ;;  %v3717_v54 = vld [vmem:[%s4302_s5 + $0x490] sm:$0xff]  ;;  %v3722_v55 = vld [vmem:[%s4302_s5 + $0x498] sm:$0xff] }
  0x47   :  { %4410 = vst [vmem:[#allocation117_spill] sm:$0xff] %v3717_v54  ;;  %4411 = vst [vmem:[#allocation118_spill] sm:$0xff] %v3722_v55  ;;  %v3727_v39 = vld [vmem:[%s4302_s5 + $0x4a0] sm:$0xff]  ;;  %v3732_v47 = vld [vmem:[%s4302_s5 + $0x4a8] sm:$0xff] }
  0x48   :  { %4412 = vst [vmem:[#allocation119_spill] sm:$0xff] %v3727_v39  ;;  %4413 = vst [vmem:[#allocation120_spill] sm:$0xff] %v3732_v47  ;;  %v3737_v63 = vld [vmem:[%s4302_s5 + $0x4b0] sm:$0xff]  ;;  %v3742_v54 = vld [vmem:[%s4302_s5 + $0x4b8] sm:$0xff] }
  0x49   :  { %4414 = vst [vmem:[#allocation121_spill] sm:$0xff] %v3737_v63  ;;  %4415 = vst [vmem:[#allocation122_spill] sm:$0xff] %v3742_v54  ;;  %v3747_v55 = vld [vmem:[%s4302_s5 + $0x4c0] sm:$0xff]  ;;  %v3752_v39 = vld [vmem:[%s4302_s5 + $0x4c8] sm:$0xff] }
  0x4a   :  { %4416 = vst [vmem:[#allocation123_spill] sm:$0xff] %v3747_v55  ;;  %4417 = vst [vmem:[#allocation124_spill] sm:$0xff] %v3752_v39  ;;  %v3757_v47 = vld [vmem:[%s4302_s5 + $0x4d0] sm:$0xff]  ;;  %v3762_v63 = vld [vmem:[%s4302_s5 + $0x4d8] sm:$0xff] }
  0x4b   :  { %4418 = vst [vmem:[#allocation125_spill] sm:$0xff] %v3757_v47  ;;  %4419 = vst [vmem:[#allocation126_spill] sm:$0xff] %v3762_v63  ;;  %v3767_v54 = vld [vmem:[%s4302_s5 + $0x4e0] sm:$0xff]  ;;  %v3772_v55 = vld [vmem:[%s4302_s5 + $0x4e8] sm:$0xff] }
  0x4c   :  { %4420 = vst [vmem:[#allocation127_spill] sm:$0xff] %v3767_v54  ;;  %4421 = vst [vmem:[#allocation128_spill] sm:$0xff] %v3772_v55  ;;  %v3777_v39 = vld [vmem:[%s4302_s5 + $0x4f0] sm:$0xff]  ;;  %v3782_v47 = vld [vmem:[%s4302_s5 + $0x4f8] sm:$0xff] }
  0x4d   :  { %4422 = vst [vmem:[#allocation129_spill] sm:$0xff] %v3777_v39  ;;  %4423 = vst [vmem:[#allocation130_spill] sm:$0xff] %v3782_v47  ;;  %v519_v63 = vld [vmem:[%s4297_s0 + $0x10] sm:$0xff]  ;;  %v517_v54 = vld [vmem:[%s4297_s0] sm:$0xff] }
  0x4e   :  { %v520_v39 = vld [vmem:[%s4297_s0 + $0x18] sm:$0x3f]  ;;  %v518_v55 = vld [vmem:[%s4297_s0 + $0x8] sm:$0xff] }
  0x4f   :  { %512 = vsyncadd [#allocation3 + $0x3], 4096  ;;  %533 = vperm.xlu1 %2819, %v519_v63   ;;  %523 = vperm.xlu0 %2818, %v517_v54   ;;  %v2820_v47 = vld [vmem:[%s4299_s2] sm:$0xff]   ;;  %v2821_v62 = vld [vmem:[%s4299_s2 + $0x8] sm:$0xff]   ;;  %vm1197_vm0 = vcmask 244736   ;;  %vm1204_vm1 = vcmask 1046528  }
  0x50   :  { %2745 = vmatprep.subr.bf16.mxu0 %v2820_v47  ;;  %v2822_v38 = vld [vmem:[%s4299_s2 + $0x10] sm:$0xff]   ;;  %v2823_v54 = vld [vmem:[%s4299_s2 + $0x18] sm:$0xff]  }
  0x51   :  { %2746 = vmatpush3.bf16.msra.mxu0 %v2820_v47  ;;  %v2828_v63 = vld [vmem:[%s4300_s3 + $0x4] ss:$16 sps:$4 sm:$0xff]   ;;  %v2833_v47 = vld [vmem:[%s4300_s3] ss:$16 sps:$4 sm:$0xff]   ;;  %v2830_v60 = vld [vmem:[%s4300_s3 + $0x8] ss:$16 sps:$4 sm:$0xff]  }
  0x52   :  { %2747 = vmatprep.subr.bf16.mxu0 %v2821_v62  ;;  %1065 = vmatprep.subr.bf16.mxu1 %v2828_v63  ;;  %v2825_v63 = vld [vmem:[%s4299_s2 + $0x28] sm:$0xff]   ;;  %v2845_v46 = vld [vmem:[%s4300_s3 + $0x40] ss:$16 sps:$4 sm:$0xff]  }
  0x53   :  { %538 = vperm.xlu1 %2819, %v520_v39   ;;  %528 = vperm.xlu0 %2818, %v518_v55   ;;  %v2824_v39 = vld [vmem:[%s4299_s2 + $0x20] sm:$0xff]   ;;  %v2838_v44 = vld [vmem:[%s4300_s3 + $0x2c] ss:$16 sps:$4 sm:$0xff]  }
  0x54   :  { %v2834_v55 = vld [vmem:[%s4300_s3 + $0x24] ss:$16 sps:$4 sm:$0xff]   ;;  %1066 = vmatpush1.bf16.msra.mxu1 %v2833_v47 }
  0x55   :  { %2748 = vmatpush3.bf16.msra.mxu0 %v2821_v62  ;;  %1067 = vmatprep.subr.bf16.mxu1 %v2834_v55  ;;  %v2839_v62 = vld [vmem:[%s4300_s3 + $0x20] ss:$16 sps:$4 sm:$0xff]   ;;  %v2846_v47 = vld [vmem:[%s4300_s3 + $0x64] ss:$16 sps:$4 sm:$0xff]  }
  0x56   :  { %2749 = vmatprep.subr.bf16.mxu0 %v2822_v38  ;;  %v2851_v55 = vld [vmem:[%s4300_s3 + $0x60] ss:$16 sps:$4 sm:$0xff]  }
  0x58   :  { %1068 = vmatpush1.bf16.msra.mxu1 %v2839_v62  ;;  %v2827_v62 = vld [vmem:[%s4299_s2 + $0x38] sm:$0xff]  }
  0x59   :  { %2750 = vmatpush3.bf16.msra.mxu0 %v2822_v38  ;;  %v2840_v38 = vld [vmem:[%s4300_s3 + $0x44] ss:$16 sps:$4 sm:$0xff]  }
  0x5a   :  { %2751 = vmatprep.subr.bf16.mxu0 %v2823_v54  ;;  %1069 = vmatprep.subr.bf16.mxu1 %v2840_v38  ;;  %v2852_v38 = vld [vmem:[%s4300_s3 + $0x84] ss:$16 sps:$4 sm:$0xff]  }
  0x5c   :  { %1070 = vmatpush1.bf16.msra.mxu1 %v2845_v46  ;;  %v2832_v46 = vld [vmem:[%s4300_s3 + $0xc] ss:$16 sps:$4 sm:$0xff]  }
  0x5d   :  { %2752 = vmatpush3.bf16.msra.mxu0 %v2823_v54  ;;  %v2826_v54 = vld [vmem:[%s4299_s2 + $0x30] sm:$0xff]   ;;  %1071 = vmatprep.subr.bf16.mxu1 %v2846_v47 }
  0x5e   :  { %2753 = vmatprep.subr.bf16.mxu0 %v2824_v39  ;;  %v2858_v47 = vld [vmem:[%s4300_s3 + $0xa4] ss:$16 sps:$4 sm:$0xff]  }
  0x60   :  { %1072 = vmatpush1.bf16.msra.mxu1 %v2851_v55  ;;  %v2864_v55 = vld [vmem:[%s4300_s3 + $0xc4] ss:$16 sps:$4 sm:$0xff]  }
  0x61   :  { %2754 = vmatpush3.bf16.msra.mxu0 %v2824_v39  ;;  %v2857_v39 = vld [vmem:[%s4300_s3 + $0x80] ss:$16 sps:$4 sm:$0xff]   ;;  %1073 = vmatprep.subr.bf16.mxu1 %v2852_v38 }
  0x62   :  { %2755 = vmatprep.subr.bf16.mxu0 %v2825_v63  ;;  %v2869_v38 = vld [vmem:[%s4300_s3 + $0xc0] ss:$16 sps:$4 sm:$0xff]  }
  0x64   :  { %1074 = vmatpush1.bf16.msra.mxu1 %v2857_v39  ;;  %v2875_v39 = vld [vmem:[%s4300_s3 + $0xe0] ss:$16 sps:$4 sm:$0xff]  }
  0x65   :  { %2756 = vmatpush3.bf16.msra.mxu0 %v2825_v63  ;;  %v2863_v63 = vld [vmem:[%s4300_s3 + $0xa0] ss:$16 sps:$4 sm:$0xff]   ;;  %1075 = vmatprep.subr.bf16.mxu1 %v2858_v47  ;;  %v2882_v47 = vld [vmem:[%s4300_s3 + $0x124] ss:$16 sps:$4 sm:$0xff]  }
  0x66   :  { %2757 = vmatprep.subr.bf16.mxu0 %v2826_v54 }
  0x68   :  { %1076 = vmatpush1.bf16.msra.mxu1 %v2863_v63  ;;  %v2887_v63 = vld [vmem:[%s4300_s3 + $0x120] ss:$16 sps:$4 sm:$0xff]  }
  0x69   :  { %2758 = vmatpush3.bf16.msra.mxu0 %v2826_v54  ;;  %1077 = vmatprep.subr.bf16.mxu1 %v2864_v55  ;;  %v2870_v54 = vld [vmem:[%s4300_s3 + $0xe4] ss:$16 sps:$4 sm:$0xff]  }
  0x6a   :  { %2759 = vmatprep.subr.bf16.mxu0 %v2827_v62  ;;  %v2888_v55 = vld [vmem:[%s4300_s3 + $0x144] ss:$16 sps:$4 sm:$0xff]  }
  0x6c   :  { %1078 = vmatpush1.bf16.msra.mxu1 %v2869_v38  ;;  %v2893_v38 = vld [vmem:[%s4300_s3 + $0x140] ss:$16 sps:$4 sm:$0xff]  }
  0x6d   :  { %2760 = vmatpush3.bf16.msra.mxu0 %v2827_v62  ;;  %1079 = vmatprep.subr.bf16.mxu1 %v2870_v54  ;;  %v2876_v62 = vld [vmem:[%s4300_s3 + $0x104] ss:$16 sps:$4 sm:$0xff]  }
  0x6e   :  { %1118 = vmatprep.subr.bf16.mxu0 %v2832_v46  ;;  %v2881_v46 = vld [vmem:[%s4300_s3 + $0x100] ss:$16 sps:$4 sm:$0xff]   ;;  %v2894_v54 = vld [vmem:[%s4300_s3 + $0x164] ss:$16 sps:$4 sm:$0xff]  }
  0x70   :  { %1080 = vmatpush1.bf16.msra.mxu1 %v2875_v39  ;;  %v2899_v39 = vld [vmem:[%s4300_s3 + $0x160] ss:$16 sps:$4 sm:$0xff]  }
  0x71   :  { %1081 = vmatprep.subr.bf16.mxu1 %v2876_v62  ;;  %v2900_v62 = vld [vmem:[%s4300_s3 + $0x184] ss:$16 sps:$4 sm:$0xff]  }
  0x74   :  { %1082 = vmatpush1.bf16.msra.mxu1 %v2881_v46  ;;  %v2905_v46 = vld [vmem:[%s4300_s3 + $0x180] ss:$16 sps:$4 sm:$0xff]  }
  0x75   :  { %1083 = vmatprep.subr.bf16.mxu1 %v2882_v47 }
  0x78   :  { %1084 = vmatpush1.bf16.msra.mxu1 %v2887_v63 }
  0x79   :  { %1085 = vmatprep.subr.bf16.mxu1 %v2888_v55  ;;  %v515_v55 = vld [vmem:[%s4298_s1 + $0x10] sm:$0xff] }
  0x7c   :  { %1086 = vmatpush1.bf16.msra.mxu1 %v2893_v38  ;;  %v513_v38 = vld [vmem:[%s4298_s1] sm:$0xff] }
  0x7d   :  { %1087 = vmatprep.subr.bf16.mxu1 %v2894_v54  ;;  %v516_v54 = vld [vmem:[%s4298_s1 + $0x18] sm:$0x3f] }
  0x80   :  { %1088 = vmatpush1.bf16.msra.mxu1 %v2899_v39  ;;  %v514_v39 = vld [vmem:[%s4298_s1 + $0x8] sm:$0xff] }
  0x81   :  { %1089 = vmatprep.subr.bf16.mxu1 %v2900_v62 }
  0x84   :  { %1090 = vmatpush1.bf16.msra.mxu1 %v2905_v46 }
  0xce   :  { %v534_v47 = vpop.permute.xlu1 %533  ;;  %v524_v63 = vpop.permute.xlu0 %523 }
  0xcf   :  { %v543_v53 = vmul.f32 %v534_v47, %v515_v55  ;;  %v541_v37 = vmul.f32 %v524_v63, %v513_v38  ;;  %v2836_v47 = vld [vmem:[%s4300_s3 + $0x28] ss:$16 sps:$4 sm:$0xff]   ;;  %v2868_v63 = vld [vmem:[%s4300_s3 + $0xcc] ss:$16 sps:$4 sm:$0xff]  }
  0xd0   :  { %v2866_v55 = vld [vmem:[%s4300_s3 + $0xc8] ss:$16 sps:$4 sm:$0xff]   ;;  %v2874_v38 = vld [vmem:[%s4300_s3 + $0xec] ss:$16 sps:$4 sm:$0xff]  }
  0xd2   :  { %v539_v62 = vpop.permute.xlu1 %538  ;;  %v529_v46 = vpop.permute.xlu0 %528 }
  0xd3   :  { %v544_v61 = vmul.f32 %v539_v62, %v516_v54  ;;  %v542_v45 = vmul.f32 %v529_v46, %v514_v39  ;;  %v2872_v54 = vld [vmem:[%s4300_s3 + $0xe8] ss:$16 sps:$4 sm:$0xff]   ;;  %v2880_v39 = vld [vmem:[%s4300_s3 + $0x10c] ss:$16 sps:$4 sm:$0xff]  }
  0xd4   :  { %v2878_v62 = vld [vmem:[%s4300_s3 + $0x108] ss:$16 sps:$4 sm:$0xff]   ;;  %v2886_v46 = vld [vmem:[%s4300_s3 + $0x12c] ss:$16 sps:$4 sm:$0xff]  }
  0xd5   :  { %v546_v52 = vpack.c.bf16 %v544_v61, %v543_v53  ;;  %v545_v36 = vpack.c.bf16 %v542_v45, %v541_v37  ;;  %v2844_v37 = vld [vmem:[%s4300_s3 + $0x4c] ss:$16 sps:$4 sm:$0xff]   ;;  %v2842_v45 = vld [vmem:[%s4300_s3 + $0x48] ss:$16 sps:$4 sm:$0xff]  }
  0xd6   :  { %v2854_v53 = vld [vmem:[%s4300_s3 + $0x88] ss:$16 sps:$4 sm:$0xff]  }
  0xd7   :  { %2761 = vmatprep.mubr.bf16.mxu0 %v545_v36  ;;  %v2850_v36 = vld [vmem:[%s4300_s3 + $0x6c] ss:$16 sps:$4 sm:$0xff]   ;;  %v2860_v61 = vld [vmem:[%s4300_s3 + $0xa8] ss:$16 sps:$4 sm:$0xff]  }
  0xd8   :  { %2762 = vmatmul.mubr.bf16.vlgmr.msra.gmra.mrb[0].mxu0 %v546_v52  ;;  %v2848_v52 = vld [vmem:[%s4300_s3 + $0x68] ss:$16 sps:$4 sm:$0xff]  }
  0xd9   :  { %1119 = vmatpush1.bf16.msra.mxu0 %v2830_v60  ;;  %v2862_v60 = vld [vmem:[%s4300_s3 + $0xac] ss:$16 sps:$4 sm:$0xff]  }
  0xda   :  { %1120 = vmatprep.subr.bf16.mxu0 %v2838_v44  ;;  %v2856_v44 = vld [vmem:[%s4300_s3 + $0x8c] ss:$16 sps:$4 sm:$0xff]  }
  0xdd   :  { %1121 = vmatpush1.bf16.msra.mxu0 %v2836_v47  ;;  %v2884_v47 = vld [vmem:[%s4300_s3 + $0x128] ss:$16 sps:$4 sm:$0xff]  }
  0xde   :  { %1122 = vmatprep.subr.bf16.mxu0 %v2844_v37  ;;  %v2892_v37 = vld [vmem:[%s4300_s3 + $0x14c] ss:$16 sps:$4 sm:$0xff]  }
  0xe1   :  { %1123 = vmatpush1.bf16.msra.mxu0 %v2842_v45  ;;  %v2890_v45 = vld [vmem:[%s4300_s3 + $0x148] ss:$16 sps:$4 sm:$0xff]  }
  0xe2   :  { %1124 = vmatprep.subr.bf16.mxu0 %v2850_v36  ;;  %v2898_v36 = vld [vmem:[%s4300_s3 + $0x16c] ss:$16 sps:$4 sm:$0xff]  }
  0xe5   :  { %1125 = vmatpush1.bf16.msra.mxu0 %v2848_v52  ;;  %v2896_v52 = vld [vmem:[%s4300_s3 + $0x168] ss:$16 sps:$4 sm:$0xff]  }
  0xe6   :  { %1126 = vmatprep.subr.bf16.mxu0 %v2856_v44  ;;  %v2904_v44 = vld [vmem:[%s4300_s3 + $0x18c] ss:$16 sps:$4 sm:$0xff]  }
  0xe9   :  { %1127 = vmatpush1.bf16.msra.mxu0 %v2854_v53  ;;  %v2902_v53 = vld [vmem:[%s4300_s3 + $0x188] ss:$16 sps:$4 sm:$0xff]  }
  0xea   :  { %1128 = vmatprep.subr.bf16.mxu0 %v2862_v60  ;;  %v2906_v60 = vld [vmem:[%s4300_s3 + $0x1a4] ss:$16 sps:$4 sm:$0xff]  }
  0xeb   :  { %1091 = vmatprep.subr.bf16.mxu1 %v2906_v60 }
  0xed   :  { %1129 = vmatpush1.bf16.msra.mxu0 %v2860_v61  ;;  %v2910_v61 = vld [vmem:[%s4300_s3 + $0x1ac] ss:$16 sps:$4 sm:$0xff]  }
  0xee   :  { %1130 = vmatprep.subr.bf16.mxu0 %v2868_v63  ;;  %v2908_v63 = vld [vmem:[%s4300_s3 + $0x1a8] ss:$16 sps:$4 sm:$0xff]  }
  0xf1   :  { %1131 = vmatpush1.bf16.msra.mxu0 %v2866_v55  ;;  %v2911_v55 = vld [vmem:[%s4300_s3 + $0x1a0] ss:$16 sps:$4 sm:$0xff]  }
  0xf2   :  { %1132 = vmatprep.subr.bf16.mxu0 %v2874_v38  ;;  %1092 = vmatpush1.bf16.msra.mxu1 %v2911_v55  ;;  %v2912_v38 = vld [vmem:[%s4300_s3 + $0x1c4] ss:$16 sps:$4 sm:$0xff]  }
  0xf3   :  { %1093 = vmatprep.subr.bf16.mxu1 %v2912_v38 }
  0xf5   :  { %1133 = vmatpush1.bf16.msra.mxu0 %v2872_v54  ;;  %v2916_v54 = vld [vmem:[%s4300_s3 + $0x1cc] ss:$16 sps:$4 sm:$0xff]  }
  0xf6   :  { %1134 = vmatprep.subr.bf16.mxu0 %v2880_v39  ;;  %v2914_v39 = vld [vmem:[%s4300_s3 + $0x1c8] ss:$16 sps:$4 sm:$0xff]  }
  0xf9   :  { %1135 = vmatpush1.bf16.msra.mxu0 %v2878_v62  ;;  %v2917_v62 = vld [vmem:[%s4300_s3 + $0x1c0] ss:$16 sps:$4 sm:$0xff]  }
  0xfa   :  { %1136 = vmatprep.subr.bf16.mxu0 %v2886_v46  ;;  %1094 = vmatpush1.bf16.msra.mxu1 %v2917_v62  ;;  %v2918_v46 = vld [vmem:[%s4300_s3 + $0x1e4] ss:$16 sps:$4 sm:$0xff]  }
  0xfb   :  { %1095 = vmatprep.subr.bf16.mxu1 %v2918_v46 }
  0xfd   :  { %1137 = vmatpush1.bf16.msra.mxu0 %v2884_v47  ;;  %v2922_v47 = vld [vmem:[%s4300_s3 + $0x1ec] ss:$16 sps:$4 sm:$0xff]  }
  0xfe   :  { %1138 = vmatprep.subr.bf16.mxu0 %v2892_v37  ;;  %v2920_v37 = vld [vmem:[%s4300_s3 + $0x1e8] ss:$16 sps:$4 sm:$0xff]  }
 0x101   :  { %1139 = vmatpush1.bf16.msra.mxu0 %v2890_v45  ;;  %v2923_v45 = vld [vmem:[%s4300_s3 + $0x1e0] ss:$16 sps:$4 sm:$0xff]  }
 0x102   :  { %1140 = vmatprep.subr.bf16.mxu0 %v2898_v36  ;;  %1096 = vmatpush1.bf16.msra.mxu1 %v2923_v45  ;;  %v2395_v36 = vld [vmem:[%s4301_s4] ss:$0 sm:$0xff] }
 0x105   :  { %1141 = vmatpush1.bf16.msra.mxu0 %v2896_v52 }
 0x106   :  { %1142 = vmatprep.subr.bf16.mxu0 %v2904_v44 }
 0x109   :  { %1143 = vmatpush1.bf16.msra.mxu0 %v2902_v53 }
 0x10a   :  { %1144 = vmatprep.subr.bf16.mxu0 %v2910_v61 }
 0x10d   :  { %1145 = vmatpush1.bf16.msra.mxu0 %v2908_v63 }
 0x10e   :  { %1146 = vmatprep.subr.bf16.mxu0 %v2916_v54 }
 0x111   :  { %1147 = vmatpush1.bf16.msra.mxu0 %v2914_v39 }
 0x112   :  { %1148 = vmatprep.subr.bf16.mxu0 %v2922_v47 }
 0x115   :  { %1149 = vmatpush1.bf16.msra.mxu0 %v2920_v37 }
 0x116   :  { %2523 = vmatprep.subr.bf16.mxu0 %v3027_v8 }
 0x1ab   :  { %v2763_v52 = vpop.f32.mrb[0].mxu0 }
 0x1ac   :  { %v659_v44 = vadd.f32 %v2763_v52, %v2395_v36  ;;  %v650_v53 = vpop.f32.mrb[1].mxu0 }
 0x1ad   :  { %v651_v60 = vadd.f32 %v2395_v36, %v650_v53  ;;  %v2764_v61 = vpop.f32.mrb[2].mxu0 }
 0x1ae   :  { %v671_v63 = vsub.f32 0.0, %v659_v44  ;;  %v662_v55 = vadd.f32 %v2764_v61, %v2395_v36  ;;  %v653_v38 = vpop.f32.mrb[3].mxu0  ;;  %v667_v62 = vmax.f32 %v659_v44, 0.0 }
 0x1af   :  { %v669_v54 = vsub.f32 0.0, %v651_v60  ;;  %v654_v39 = vadd.f32 %v2395_v36, %v653_v38  ;;  %v665_v47 = vmax.f32 %v651_v60, 0.0  ;;  %v2924_v36 = vld [vmem:[%s4299_s2 + $0x50] sm:$0xff]  }
 0x1b0   :  { %v668_v51 = vmax.f32 %v662_v55, 0.0  ;;  %v672_v46 = vsub.f32 0.0, %v662_v55  ;;  %v675_v35 = vmax.f32 %v671_v63, 0.0 }
 0x1b1   :  { %v666_v45 = vmax.f32 %v654_v39, 0.0  ;;  %v670_v37 = vsub.f32 0.0, %v654_v39  ;;  %v673_v50 = vmax.f32 %v669_v54, 0.0 }
 0x1b2   :  { %v676_v59 = vmax.f32 %v672_v46, 0.0  ;;  %v679_v43 = vpack.c.bf16 %v668_v51, %v667_v62 }
 0x1b3   :  { %v674_v34 = vmax.f32 %v670_v37, 0.0  ;;  %v677_v52 = vpack.c.bf16 %v666_v45, %v665_v47 }
 0x1b4   :  { %v680_v58 = vpack.c.bf16 %v676_v59, %v675_v35 }
 0x1b5   :  { %v678_v53 = vpack.c.bf16 %v674_v34, %v673_v50 }
 0x1b7   :  { %1097 = vmatprep.mubr.bf16.mxu1 %v678_v53  ;;  %1150 = vmatprep.mubr.bf16.mxu0 %v678_v53 }
 0x1b8   :  { %1098 = vmatmul.mubr.bf16.vlgmr.msra.gmra.mrb[0].mxu1 %v677_v52  ;;  %1151 = vmatmul.mubr.bf16.vlgmr.msra.gmra.mrb[4].mxu0 %v677_v52 }
 0x1b9   :  { %1107 = vmatprep.mubr.bf16.mxu1 %v680_v58  ;;  %1160 = vmatprep.mubr.bf16.mxu0 %v680_v58 }
 0x1c0   :  { %1108 = vmatmul.mubr.bf16.gmra.mrb[4].mxu1 %v679_v43  ;;  %1161 = vmatmul.mubr.bf16.gmra.mrb[8].mxu0 %v679_v43 }
 0x1c1   :  { %2769 = vmatprep.mubr.msk.bf16.mxu1 %vm1197_vm0, %v2924_v36 }
 0x28b   :  { %v1099_v51 = vpop.f32.mrb[0].mxu1  ;;  %v1152_v44 = vpop.f32.mrb[4].mxu0 }
 0x28c   :  { %v1101_v60 = vpop.f32.mrb[1].mxu1  ;;  %v1154_v35 = vpop.f32.mrb[5].mxu0 }
 0x28d   :  { %v1103_v34 = vpop.f32.mrb[2].mxu1  ;;  %v1156_v50 = vpop.f32.mrb[6].mxu0 }
 0x28e   :  { %v1171_v59 = vpack.c.bf16 %v1103_v34, %v1099_v51  ;;  %v1173_v61 = vpack.c.bf16 %v1156_v50, %v1152_v44  ;;  %v1105_v63 = vpop.f32.mrb[3].mxu1  ;;  %v1158_v55 = vpop.f32.mrb[7].mxu0  ;;  %v2927_v50 = vld [vmem:[%s4299_s2 + $0x48] sm:$0xff]  }
 0x28f   :  { %v1172_v58 = vpack.c.bf16 %v1105_v63, %v1101_v60  ;;  %v1174_v38 = vpack.c.bf16 %v1158_v55, %v1154_v35  ;;  %v2925_v60 = vld [vmem:[%s4299_s2 + $0x58] sm:$0xff]   ;;  %v2926_v35 = vld [vmem:[%s4299_s2 + $0x40] sm:$0xff]   ;;  %v2928_v63 = vld [vmem:[%s4299_s2 + $0x70] sm:$0xff]  }
 0x290   :  { %v2929_v55 = vld [vmem:[%s4299_s2 + $0x78] sm:$0xff]  }
 0x291   :  { %2765 = vmatprep.subr.bf16.mxu1 %v1172_v58 }
 0x292   :  { %2766 = vmatpush3.bf16.msra.mxu1 %v1172_v58  ;;  %v2930_v58 = vld [vmem:[%s4299_s2 + $0x60] sm:$0xff]  }
 0x293   :  { %v1109_v43 = vpop.f32.mrb[4].mxu1  ;;  %v1162_v54 = vpop.f32.mrb[8].mxu0 }
 0x294   :  { %v1111_v39 = vpop.f32.mrb[5].mxu1  ;;  %v1164_v62 = vpop.f32.mrb[9].mxu0 }
 0x295   :  { %v1113_v46 = vpop.f32.mrb[6].mxu1  ;;  %v1166_v47 = vpop.f32.mrb[10].mxu0 }
 0x296   :  { %v1175_v45 = vpack.c.bf16 %v1113_v46, %v1109_v43  ;;  %v1177_v37 = vpack.c.bf16 %v1166_v47, %v1162_v54  ;;  %v1115_v52 = vpop.f32.mrb[7].mxu1  ;;  %v1168_v53 = vpop.f32.mrb[11].mxu0  ;;  %v2931_v43 = vld [vmem:[%s4299_s2 + $0x68] sm:$0xff]   ;;  %v2476_v54 = vld [vmem:[%s4301_s4 + $0x1] ss:$0 sm:$0xff] }
 0x297   :  { %v1176_v36 = vpack.c.bf16 %v1115_v52, %v1111_v39  ;;  %v1178_v51 = vpack.c.bf16 %v1168_v53, %v1164_v62  ;;  %v2485_v53 = vld [vmem:[%s4301_s4 + $0x2] ss:$0 sm:$0xff] }
 0x298   :  { %v1274_v34 = vsel %vm1204_vm1, %v1175_v45, 0 }
 0x299   :  { %v1206_v44 = vsel %vm1204_vm1, %v1176_v36, 0  ;;  %2811 = vmatprep.subr.msk.bf16.mxu1 %vm1204_vm1, %v1176_v36 }
 0x29a   :  { %2768 = vmatpush3.bf16.msra.mxu1 %v1206_v44 }
 0x29b   :  { %2773 = vmatprep.subr.bf16.mxu1 %v1171_v59 }
 0x29d   :  { %2770 = vmatmul.mubr.msk.bf16.vlgmr.msra.gmra.mrb[8].mxu1 %vm1197_vm0, %v2925_v60 }
 0x29e   :  { %2774 = vmatpush3.bf16.msra.mxu1 %v1171_v59  ;;  %2777 = vmatprep.mubr.msk.bf16.mxu1 %vm1197_vm0, %v2926_v35  ;;  %v1359_v59 = vsel %vm1204_vm1, %v1178_v51, 0 }
 0x29f   :  { %2812 = vmatprep.subr.msk.bf16.mxu1 %vm1204_vm1, %v1175_v45 }
 0x2a2   :  { %2776 = vmatpush3.bf16.msra.mxu1 %v1274_v34 }
 0x2a3   :  { %2781 = vmatprep.subr.bf16.mxu1 %v1174_v38 }
 0x2a9   :  { %2778 = vmatmul.mubr.msk.bf16.vlgmr.msra.gmra.mrb[8].mxu1 %vm1197_vm0, %v2927_v50 }
 0x2aa   :  { %2782 = vmatpush3.bf16.msra.mxu1 %v1174_v38  ;;  %2785 = vmatprep.mubr.msk.bf16.mxu1 %vm1197_vm0, %v2928_v63  ;;  %v1427_v38 = vsel %vm1204_vm1, %v1177_v37, 0 }
 0x2ab   :  { %2813 = vmatprep.subr.msk.bf16.mxu1 %vm1204_vm1, %v1178_v51 }
 0x2ae   :  { %2784 = vmatpush3.bf16.msra.mxu1 %v1359_v59 }
 0x2af   :  { %2789 = vmatprep.subr.bf16.mxu1 %v1173_v61 }
 0x2b1   :  { %2786 = vmatmul.mubr.msk.bf16.vlgmr.msra.gmra.mrb[12].mxu1 %vm1197_vm0, %v2929_v55 }
 0x2b2   :  { %2790 = vmatpush3.bf16.msra.mxu1 %v1173_v61  ;;  %2793 = vmatprep.mubr.msk.bf16.mxu1 %vm1197_vm0, %v2930_v58 }
 0x2b3   :  { %2814 = vmatprep.subr.msk.bf16.mxu1 %vm1204_vm1, %v1177_v37 }
 0x2b6   :  { %2792 = vmatpush3.bf16.msra.mxu1 %v1427_v38 }
 0x2b7   :  { %2545 = vmatprep.subr.bf16.mxu1 %v3107_v24 }
 0x2bd   :  { %2794 = vmatmul.mubr.msk.bf16.vlgmr.msra.gmra.mrb[12].mxu1 %vm1197_vm0, %v2931_v43 }
 0x37c   :  { %v2779_v39 = vpop.f32.mrb[8].mxu1 }
 0x37d   :  { %v4070_v62 = vadd.f32 %v2779_v39, %v2476_v54  ;;  %v1310_v61 = vpop.f32.mrb[9].mxu1 }
 0x37e   :  { %v4072_v46 = vadd.f32 %v2476_v54, %v1310_v61  ;;  %v2780_v47 = vpop.f32.mrb[10].mxu1 }
 0x37f   :  { %v4074_v45 = vadd.f32 %v2780_v47, %v2476_v54  ;;  %v1313_v37 = vpop.f32.mrb[11].mxu1 }
 0x380   :  { %v4076_v52 = vadd.f32 %v2476_v54, %v1313_v37 }
 0x390   :  { %v2795_v36 = vpop.f32.mrb[12].mxu1 }
 0x391   :  { %v4081_v51 = vadd.f32 %v2795_v36, %v2485_v53  ;;  %v1463_v44 = vpop.f32.mrb[13].mxu1 }
 0x392   :  { %v1483_v60 = vadd.f32 %v2485_v53, %v1463_v44  ;;  %v2796_v35 = vpop.f32.mrb[14].mxu1 }
 0x393   :  { %v4083_v34 = vadd.f32 %v2796_v35, %v2485_v53  ;;  %v1466_v50 = vpop.f32.mrb[15].mxu1 }
 0x394   :  { %v1484_v63 = vadd.f32 %v2485_v53, %v1466_v50  ;;  %v1492_v59 = vmax.f32 %v1483_v60, 0.0  ;;  %v1496_v58 = vsub.f32 0.0, %v1483_v60 }
 0x396   :  { %v1494_v55 = vmax.f32 %v1484_v63, 0.0  ;;  %v1498_v38 = vsub.f32 0.0, %v1484_v63 }
 0x397   :  { %2933 = dma.done.wait [#allocation3], 8192 }
 0x398   :  { %2934 = vsyncadd [#allocation3], 4294959104  ;;  %2524 = vmatpush3.bf16.msra.mxu0 %v2987_v0  ;;  %2546 = vmatpush3.bf16.msra.mxu1 %v3067_v16  ;;  %v1516_v43 = vpack.c.bf16 %v1494_v55, %v1492_v59  ;;  %v1500_v54 = vmax.f32 %v1496_v58, 0.0  ;;  %v1502_v39 = vmax.f32 %v1498_v38, 0.0  ;;  %v1495_v0 = vsub.f32 0.0, %v4072_v46  ;;  %v4431_v24 = vld [vmem:[#allocation19_spill] sm:$0xff] }
 0x399   :  { %2525 = vmatprep.subr.bf16.mxu0 %v3032_v9  ;;  %2547 = vmatprep.subr.bf16.mxu1 %v3112_v25  ;;  %v1493_v9 = vmax.f32 %v4076_v52, 0.0  ;;  %v4432_v25 = vld [vmem:[#allocation31_spill] sm:$0xff]  ;;  %v4444_v47 = vld [vmem:[#allocation34_spill] sm:$0xff]  ;;  %v4445_v53 = vld [vmem:[#allocation17_spill] sm:$0xff]  ;;  %vm2943_vm2 = vmmov 0   ;;  %vm1764_vm3 = vcmask 130048  }
 0x39a   :  { %1624 = vmatprep.mubr.bf16.mxu0 %v1516_v43  ;;  %v1518_v8 = vpack.c.bf16 %v1502_v39, %v1500_v54  ;;  %v4442_v61 = vld [vmem:[#allocation27_spill] sm:$0xff]  ;;  %v4446_v36 = vld [vmem:[#allocation28_spill] sm:$0xff] }
 0x39b   :  { %v2486_v44 = vld [vmem:[%s4301_s4 + $0x3] ss:$0 sm:$0xff] }
 0x39c   :  { %2526 = vmatpush3.bf16.msra.mxu0 %v2992_v1  ;;  %2548 = vmatpush3.bf16.msra.mxu1 %v3072_v17  ;;  %v1497_v1 = vsub.f32 0.0, %v4076_v52 }
 0x39d   :  { %2527 = vmatprep.subr.bf16.mxu0 %v3037_v10  ;;  %2549 = vmatprep.subr.bf16.mxu1 %v3117_v26  ;;  %v1499_v10 = vmax.f32 %v1495_v0, 0.0  ;;  %v4433_v26 = vld [vmem:[#allocation14_spill] sm:$0xff] }
 0x39e   :  { %1665 = vmatprep.mubr.bf16.mxu1 %v1518_v8 }
 0x3a0   :  { %2528 = vmatpush3.bf16.msra.mxu0 %v2997_v2  ;;  %2550 = vmatpush3.bf16.msra.mxu1 %v3077_v18  ;;  %v1508_v2 = vsub.f32 0.0, %v4081_v51  ;;  %v4425_v18 = vld [vmem:[#allocation12_spill] sm:$0xff] }
 0x3a1   :  { %2529 = vmatprep.subr.bf16.mxu0 %v3042_v11  ;;  %2551 = vmatprep.subr.bf16.mxu1 %v3122_v27  ;;  %v1501_v11 = vmax.f32 %v1497_v1, 0.0  ;;  %v4434_v27 = vld [vmem:[#allocation25_spill] sm:$0xff] }
 0x3a3   :  { %v1517_v17 = vpack.c.bf16 %v1501_v11, %v1499_v10 }
 0x3a4   :  { %2530 = vmatpush3.bf16.msra.mxu0 %v3002_v3  ;;  %2552 = vmatpush3.bf16.msra.mxu1 %v3082_v19  ;;  %v1510_v3 = vsub.f32 0.0, %v4083_v34  ;;  %v4426_v19 = vld [vmem:[#allocation23_spill] sm:$0xff] }
 0x3a5   :  { %2531 = vmatprep.subr.bf16.mxu0 %v3047_v12  ;;  %2553 = vmatprep.subr.bf16.mxu1 %v3127_v28  ;;  %v1506_v12 = vmax.f32 %v4083_v34, 0.0  ;;  %v4435_v28 = vld [vmem:[#allocation20_spill] sm:$0xff] }
 0x3a8   :  { %2532 = vmatpush3.bf16.msra.mxu0 %v3007_v4  ;;  %2554 = vmatpush3.bf16.msra.mxu1 %v3087_v20  ;;  %v1491_v4 = vmax.f32 %v4072_v46, 0.0  ;;  %v4427_v20 = vld [vmem:[#allocation18_spill] sm:$0xff] }
 0x3a9   :  { %2533 = vmatprep.subr.bf16.mxu0 %v3052_v13  ;;  %2555 = vmatprep.subr.bf16.mxu1 %v3132_v29  ;;  %v1512_v13 = vmax.f32 %v1508_v2, 0.0  ;;  %v4436_v29 = vld [vmem:[#allocation32_spill] sm:$0xff]  ;;  %v4443_v46 = vld [vmem:[#allocation22_spill] sm:$0xff] }
 0x3aa   :  { %v1515_v16 = vpack.c.bf16 %v1493_v9, %v1491_v4 }
 0x3ac   :  { %2534 = vmatpush3.bf16.msra.mxu0 %v3012_v5  ;;  %2556 = vmatpush3.bf16.msra.mxu1 %v3092_v21  ;;  %v1504_v5 = vmax.f32 %v4081_v51, 0.0  ;;  %v4428_v21 = vld [vmem:[#allocation30_spill] sm:$0xff] }
 0x3ad   :  { %2535 = vmatprep.subr.bf16.mxu0 %v3057_v14  ;;  %2557 = vmatprep.subr.bf16.mxu1 %v3137_v30  ;;  %v1514_v14 = vmax.f32 %v1510_v3, 0.0  ;;  %v1507_v30 = vsub.f32 0.0, %v4070_v62 }
 0x3b0   :  { %2536 = vmatpush3.bf16.msra.mxu0 %v3017_v6  ;;  %2558 = vmatpush3.bf16.msra.mxu1 %v3097_v22  ;;  %v1520_v6 = vpack.c.bf16 %v1506_v12, %v1504_v5  ;;  %v4429_v22 = vld [vmem:[#allocation13_spill] sm:$0xff] }
 0x3b1   :  { %2537 = vmatprep.subr.bf16.mxu0 %v3062_v15  ;;  %2559 = vmatprep.subr.bf16.mxu1 %v3142_v31  ;;  %v1522_v15 = vpack.c.bf16 %v1514_v14, %v1512_v13  ;;  %v1509_v31 = vsub.f32 0.0, %v4074_v45 }
 0x3b4   :  { %2538 = vmatpush3.bf16.msra.mxu0 %v3022_v7  ;;  %2560 = vmatpush3.bf16.msra.mxu1 %v3102_v23  ;;  %v4424_v7 = vld [vmem:[#allocation29_spill] sm:$0xff]  ;;  %v4430_v23 = vld [vmem:[#allocation24_spill] sm:$0xff] }
 0x3b5   :  { %2567 = vmatprep.subr.bf16.mxu0 %v3187_v40  ;;  %2589 = vmatprep.subr.bf16.mxu1 %v3267_v56  ;;  %v4439_v40 = vld [vmem:[#allocation21_spill] sm:$0xff]  ;;  %v1513_v56 = vmax.f32 %v1509_v31, 0.0  ;;  %v4448_v31 = vld [vmem:[#allocation59_spill] sm:$0xff] }
 0x3b7   :  { %1625 = vmatmul.mubr.bf16.vlgmr.msra.gmra.mrb[12].mxu0 %v1515_v16  ;;  %1666 = vmatmul.mubr.bf16.vlgmr.msra.gmra.mrb[16].mxu1 %v1517_v17 }
 0x3b8   :  { %2568 = vmatpush3.bf16.msra.mxu0 %v3147_v32  ;;  %2590 = vmatpush3.bf16.msra.mxu1 %v3227_v48  ;;  %v4437_v32 = vld [vmem:[#allocation15_spill] sm:$0xff]  ;;  %v1505_v48 = vmax.f32 %v4074_v45, 0.0 }
 0x3b9   :  { %2569 = vmatprep.subr.bf16.mxu0 %v3192_v41  ;;  %2591 = vmatprep.subr.bf16.mxu1 %v3272_v57  ;;  %v4440_v41 = vld [vmem:[#allocation33_spill] sm:$0xff]  ;;  %v4441_v57 = vld [vmem:[#allocation16_spill] sm:$0xff] }
 0x3ba   :  { %1706 = vmatprep.mubr.bf16.mxu0 %v1520_v6  ;;  %1747 = vmatprep.mubr.bf16.mxu1 %v1522_v15 }
 0x3bc   :  { %2570 = vmatpush3.bf16.msra.mxu0 %v3152_v33  ;;  %2592 = vmatpush3.bf16.msra.mxu1 %v3232_v49  ;;  %v4438_v33 = vld [vmem:[#allocation26_spill] sm:$0xff]  ;;  %v1511_v49 = vmax.f32 %v1507_v30, 0.0  ;;  %v4447_v30 = vld [vmem:[#allocation43_spill] sm:$0xff] }
 0x3bd   :  { %2571 = vmatprep.subr.bf16.mxu0 %v3197_v42  ;;  %2593 = vmatprep.subr.bf16.mxu1 %v4424_v7  ;;  %v1503_v42 = vmax.f32 %v4070_v62, 0.0  ;;  %v2942_v62 = vmov 0.0  }
 0x3be   :  { %v1521_v52 = vpack.c.bf16 %v1513_v56, %v1511_v49 }
 0x3bf   :  { %v1519_v37 = vpack.c.bf16 %v1505_v48, %v1503_v42 }
 0x3c0   :  { %2572 = vmatpush3.bf16.msra.mxu0 %v4425_v18  ;;  %2594 = vmatpush3.bf16.msra.mxu1 %v4426_v19  ;;  %v2932_v19 = vld [vmem:[%s4299_s2 + $0x80] sm:$0xff]  }
 0x3c1   :  { %2573 = vmatprep.subr.bf16.mxu0 %v4427_v20  ;;  %2595 = vmatprep.subr.bf16.mxu1 %v4428_v21 }
 0x3c4   :  { %2574 = vmatpush3.bf16.msra.mxu0 %v4429_v22  ;;  %2596 = vmatpush3.bf16.msra.mxu1 %v4430_v23 }
 0x3c5   :  { %2575 = vmatprep.subr.bf16.mxu0 %v4431_v24  ;;  %2597 = vmatprep.subr.bf16.mxu1 %v4432_v25 }
 0x3c8   :  { %2576 = vmatpush3.bf16.msra.mxu0 %v4433_v26  ;;  %2598 = vmatpush3.bf16.msra.mxu1 %v4434_v27 }
 0x3c9   :  { %2577 = vmatprep.subr.bf16.mxu0 %v4435_v28  ;;  %2599 = vmatprep.subr.bf16.mxu1 %v4436_v29 }
 0x3cc   :  { %2578 = vmatpush3.bf16.msra.mxu0 %v4437_v32  ;;  %2600 = vmatpush3.bf16.msra.mxu1 %v4438_v33 }
 0x3cd   :  { %2579 = vmatprep.subr.bf16.mxu0 %v4439_v40  ;;  %2601 = vmatprep.subr.bf16.mxu1 %v4440_v41 }
 0x3d0   :  { %2580 = vmatpush3.bf16.msra.mxu0 %v4441_v57  ;;  %2602 = vmatpush3.bf16.msra.mxu1 %v4442_v61 }
 0x3d1   :  { %2581 = vmatprep.subr.bf16.mxu0 %v4443_v46  ;;  %2603 = vmatprep.subr.bf16.mxu1 %v4444_v47 }
 0x3d4   :  { %2582 = vmatpush3.bf16.msra.mxu0 %v4445_v53  ;;  %2604 = vmatpush3.bf16.msra.mxu1 %v4446_v36 }
 0x3d5   :  { %2797 = vmatprep.subr.bf16.mxu0 %v2942_v62  ;;  %2635 = vmatprep.subr.bf16.mxu1 %v4448_v31 }
 0x3d7   :  { %1707 = vmatmul.mubr.bf16.vlgmr.msra.gmra.mrb[16].mxu0 %v1519_v37  ;;  %1748 = vmatmul.mubr.bf16.vlgmr.msra.gmra.mrb[20].mxu1 %v1521_v52 }
 0x3d8   :  { %2799 = vmatprep.mubr.msk.bf16.mxu0 %vm2943_vm2, %v2942_v62 }
 0x48a   :  { %v2539_v45 = vpop.f32.mrb[12].mxu0  ;;  %v2561_v51 = vpop.f32.mrb[16].mxu1 }
 0x48b   :  { %v2540_v60 = vpop.f32.mrb[13].mxu0  ;;  %v2562_v35 = vpop.f32.mrb[17].mxu1 }
 0x48c   :  { %v2541_v34 = vadd.f32 %v2540_v60, %v2539_v45  ;;  %v2563_v50 = vadd.f32 %v2562_v35, %v2561_v51  ;;  %v2542_v63 = vpop.f32.mrb[14].mxu0  ;;  %v2564_v59 = vpop.f32.mrb[18].mxu1 }
 0x48d   :  { %v2543_v55 = vpop.f32.mrb[15].mxu0  ;;  %v2565_v58 = vpop.f32.mrb[19].mxu1 }
 0x48e   :  { %v1627_v38 = vadd.f32 %v2541_v34, %v2486_v44  ;;  %v2544_v43 = vadd.f32 %v2543_v55, %v2542_v63  ;;  %v2566_v54 = vadd.f32 %v2565_v58, %v2564_v59 }
 0x490   :  { %v1668_v39 = vadd.f32 %v2563_v50, %v1627_v38  ;;  %v1630_v8 = vadd.f32 %v2544_v43, %v2486_v44 }
 0x492   :  { %v1671_v0 = vadd.f32 %v2566_v54, %v1630_v8 }
 0x4aa   :  { %v2583_v1 = vpop.f32.mrb[16].mxu0  ;;  %v2605_v2 = vpop.f32.mrb[20].mxu1 }
 0x4ab   :  { %v2584_v3 = vpop.f32.mrb[17].mxu0  ;;  %v2606_v4 = vpop.f32.mrb[21].mxu1 }
 0x4ac   :  { %v2585_v9 = vadd.f32 %v2584_v3, %v2583_v1  ;;  %v2607_v10 = vadd.f32 %v2606_v4, %v2605_v2  ;;  %v2586_v11 = vpop.f32.mrb[18].mxu0  ;;  %v2608_v5 = vpop.f32.mrb[22].mxu1 }
 0x4ad   :  { %v2587_v12 = vpop.f32.mrb[19].mxu0  ;;  %v2609_v13 = vpop.f32.mrb[23].mxu1 }
 0x4ae   :  { %v1709_v14 = vadd.f32 %v2585_v9, %v1668_v39  ;;  %v2588_v16 = vadd.f32 %v2587_v12, %v2586_v11  ;;  %v2610_v17 = vadd.f32 %v2609_v13, %v2608_v5 }
 0x4b0   :  { %v4164_v6 = vadd.f32 %v2607_v10, %v1709_v14  ;;  %v1712_v15 = vadd.f32 %v2588_v16, %v1671_v0 }
 0x4b2   :  { %v4166_v7 = vadd.f32 %v2610_v17, %v1712_v15  ;;  %v1824_v32 = vsub.f32 0.0, %v4164_v6 }
 0x4b4   :  { %v1758_v18 = vpack.c.bf16 %v4166_v7, %v4164_v6  ;;  %v1827_v33 = vsub.f32 0.0, %v4166_v7 }
 0x4b6   :  { %2798 = vmatpush3.bf16.msra.mxu0 %v1758_v18 }
 0x4b7   :  { %2613 = vmatprep.subr.bf16.mxu0 %v4447_v30 }
 0x4b9   :  { %2800 = vmatmul.mubr.msk.bf16.vlgmr.msra.gmra.mrb[20].mxu0 %vm1764_vm3, %v2932_v19 }
 0x58c   :  { %v1802_v20 = vpop.f32.mrb[20].mxu0 }
 0x58d   :  { %v1809_v21 = vmax.f32 %v1802_v20, 0.0  ;;  %v1811_v22 = vsub.f32 0.0, %v1802_v20  ;;  %v2801_v23 = vpop.f32.mrb[21].mxu0 }
 0x58e   :  { %v1805_v24 = vpop.f32.mrb[22].mxu0 }
 0x58f   :  { %v1813_v25 = vmax.f32 %v1811_v22, 0.0  ;;  %1815 = vst [vmem:[%s4304_s7] sm:$0xff] %v1809_v21  ;;  %v1810_v26 = vmax.f32 %v1805_v24, 0.0  ;;  %v1812_v27 = vsub.f32 0.0, %v1805_v24  ;;  %v2802_v28 = vpop.f32.mrb[23].mxu0 }
 0x591   :  { %1816 = vst [vmem:[%s4304_s7 + $0x8] sm:$0xff] %v1813_v25  ;;  %v1814_v29 = vmax.f32 %v1812_v27, 0.0  ;;  %1817 = vst [vmem:[%s4304_s7 + $0x10] sm:$0xff] %v1810_v26 }
 0x593   :  { %1818 = vst [vmem:[%s4304_s7 + $0x18] sm:$0xff] %v1814_v29 }
 0x594   :  { %2935 = dma.done.wait [#allocation3 + $0x1], 4096 }
 0x595   :  { %2936 = vsyncadd [#allocation3 + $0x1], 4294963200  ;;  %v4449_v40 = vld [vmem:[#allocation35_spill] sm:$0xff]  ;;  %v4451_v42 = vld [vmem:[#allocation44_spill] sm:$0xff]  ;;  %v1825_v49 = vmax.f32 %v1824_v32, 0.0  ;;  %v1828_v56 = vmax.f32 %v1827_v33, 0.0 }
 0x596   :  { %2614 = vmatpush3.bf16.msra.mxu0 %v4449_v40  ;;  %v4450_v41 = vld [vmem:[#allocation51_spill] sm:$0xff]  ;;  %v4452_v48 = vld [vmem:[#allocation60_spill] sm:$0xff]  ;;  %v4455_v37 = vld [vmem:[#allocation45_spill] sm:$0xff]  ;;  %v1823_v54 = vmax.f32 %v4164_v6, 0.0  ;;  %v1826_v39 = vmax.f32 %v4166_v7, 0.0 }
 0x597   :  { %2636 = vmatpush3.bf16.msra.mxu1 %v4450_v41  ;;  %2615 = vmatprep.subr.bf16.mxu0 %v4451_v42  ;;  %v1830_v57 = vpack.c.bf16 %v1825_v49, %v1825_v49  ;;  %v1832_v61 = vpack.c.bf16 %v1828_v56, %v1828_v56  ;;  %v4453_v46 = vld [vmem:[#allocation36_spill] sm:$0xff]  ;;  %v4456_v52 = vld [vmem:[#allocation61_spill] sm:$0xff]  ;;  %v4459_v62 = vld [vmem:[#allocation46_spill] sm:$0xff] }
 0x598   :  { %2637 = vmatprep.subr.bf16.mxu1 %v4452_v48  ;;  %v4454_v47 = vld [vmem:[#allocation52_spill] sm:$0xff]  ;;  %v4457_v53 = vld [vmem:[#allocation37_spill] sm:$0xff]  ;;  %v4460_v45 = vld [vmem:[#allocation62_spill] sm:$0xff]  ;;  %v1829_v3 = vpack.c.bf16 %v1823_v54, %v1823_v54  ;;  %v1831_v4 = vpack.c.bf16 %v1826_v39, %v1826_v39 }
 0x599   :  { %1902 = vmatprep.mubr.bf16.mxu0 %v1830_v57  ;;  %1942 = vmatprep.mubr.bf16.mxu1 %v1832_v61  ;;  %v4458_v36 = vld [vmem:[#allocation53_spill] sm:$0xff]  ;;  %v4461_v51 = vld [vmem:[#allocation38_spill] sm:$0xff]  ;;  %v4463_v60 = vld [vmem:[#allocation47_spill] sm:$0xff] }
 0x59a   :  { %2616 = vmatpush3.bf16.msra.mxu0 %v4453_v46  ;;  %v4462_v44 = vld [vmem:[#allocation54_spill] sm:$0xff]  ;;  %v4464_v35 = vld [vmem:[#allocation63_spill] sm:$0xff]  ;;  %v4467_v63 = vld [vmem:[#allocation48_spill] sm:$0xff] }
 0x59b   :  { %2638 = vmatpush3.bf16.msra.mxu1 %v4454_v47  ;;  %2617 = vmatprep.subr.bf16.mxu0 %v4455_v37  ;;  %v4465_v34 = vld [vmem:[#allocation39_spill] sm:$0xff]  ;;  %v4468_v59 = vld [vmem:[#allocation64_spill] sm:$0xff]  ;;  %v4471_v38 = vld [vmem:[#allocation49_spill] sm:$0xff] }
 0x59c   :  { %2639 = vmatprep.subr.bf16.mxu1 %v4456_v52  ;;  %v4466_v50 = vld [vmem:[#allocation55_spill] sm:$0xff]  ;;  %v4469_v55 = vld [vmem:[#allocation40_spill] sm:$0xff]  ;;  %v4472_v43 = vld [vmem:[#allocation65_spill] sm:$0xff] }
 0x59d   :  { %v4470_v58 = vld [vmem:[#allocation56_spill] sm:$0xff]  ;;  %v4473_v8 = vld [vmem:[#allocation41_spill] sm:$0xff]  ;;  %v4475_v1 = vld [vmem:[#allocation50_spill] sm:$0xff] }
 0x59e   :  { %2618 = vmatpush3.bf16.msra.mxu0 %v4457_v53  ;;  %v4474_v0 = vld [vmem:[#allocation57_spill] sm:$0xff]  ;;  %v4476_v2 = vld [vmem:[#allocation66_spill] sm:$0xff]  ;;  %v2489_v12 = vld [vmem:[%s4301_s4 + $0x4] ss:$0 sm:$0xff] }
 0x59f   :  { %2640 = vmatpush3.bf16.msra.mxu1 %v4458_v36  ;;  %2619 = vmatprep.subr.bf16.mxu0 %v4459_v62  ;;  %v4477_v9 = vld [vmem:[#allocation42_spill] sm:$0xff]  ;;  %v4479_v21 = vld [vmem:[#allocation75_spill] sm:$0xff] }
 0x5a0   :  { %2641 = vmatprep.subr.bf16.mxu1 %v4460_v45  ;;  %v4478_v10 = vld [vmem:[#allocation58_spill] sm:$0xff]  ;;  %v4480_v22 = vld [vmem:[#allocation91_spill] sm:$0xff] }
 0x5a2   :  { %2620 = vmatpush3.bf16.msra.mxu0 %v4461_v51 }
 0x5a3   :  { %2642 = vmatpush3.bf16.msra.mxu1 %v4462_v44  ;;  %2621 = vmatprep.subr.bf16.mxu0 %v4463_v60 }
 0x5a4   :  { %2643 = vmatprep.subr.bf16.mxu1 %v4464_v35 }
 0x5a6   :  { %2622 = vmatpush3.bf16.msra.mxu0 %v4465_v34 }
 0x5a7   :  { %2644 = vmatpush3.bf16.msra.mxu1 %v4466_v50  ;;  %2623 = vmatprep.subr.bf16.mxu0 %v4467_v63 }
 0x5a8   :  { %2645 = vmatprep.subr.bf16.mxu1 %v4468_v59 }
 0x5aa   :  { %2624 = vmatpush3.bf16.msra.mxu0 %v4469_v55 }
 0x5ab   :  { %2646 = vmatpush3.bf16.msra.mxu1 %v4470_v58  ;;  %2625 = vmatprep.subr.bf16.mxu0 %v4471_v38 }
 0x5ac   :  { %2647 = vmatprep.subr.bf16.mxu1 %v4472_v43 }
 0x5ae   :  { %2626 = vmatpush3.bf16.msra.mxu0 %v4473_v8 }
 0x5af   :  { %2648 = vmatpush3.bf16.msra.mxu1 %v4474_v0  ;;  %2627 = vmatprep.subr.bf16.mxu0 %v4475_v1 }
 0x5b0   :  { %2649 = vmatprep.subr.bf16.mxu1 %v4476_v2 }
 0x5b2   :  { %2628 = vmatpush3.bf16.msra.mxu0 %v4477_v9 }
 0x5b3   :  { %2650 = vmatpush3.bf16.msra.mxu1 %v4478_v10  ;;  %2657 = vmatprep.subr.bf16.mxu0 %v4479_v21 }
 0x5b4   :  { %2679 = vmatprep.subr.bf16.mxu1 %v4480_v22 }
 0x5b5   :  { %1903 = vmatmul.mubr.bf16.vlgmr.msra.gmra.mrb[24].mxu0 %v1829_v3 }
 0x5b6   :  { %1943 = vmatmul.mubr.bf16.vlgmr.msra.gmra.mrb[24].mxu1 %v1831_v4 }
 0x688   :  { %v2629_v11 = vpop.f32.mrb[24].mxu0 }
 0x689   :  { %v2651_v5 = vpop.f32.mrb[24].mxu1  ;;  %v2630_v13 = vpop.f32.mrb[25].mxu0 }
 0x68a   :  { %v2652_v14 = vpop.f32.mrb[25].mxu1  ;;  %v2631_v16 = vadd.f32 %v2630_v13, %v2629_v11  ;;  %v2632_v6 = vpop.f32.mrb[26].mxu0 }
 0x68b   :  { %v2653_v17 = vadd.f32 %v2652_v14, %v2651_v5  ;;  %v2654_v15 = vpop.f32.mrb[26].mxu1  ;;  %v2633_v7 = vpop.f32.mrb[27].mxu0 }
 0x68c   :  { %v2655_v18 = vpop.f32.mrb[27].mxu1  ;;  %v1905_v19 = vadd.f32 %v2631_v16, %v2489_v12 }
 0x68e   :  { %v1945_v20 = vadd.f32 %v2653_v17, %v1905_v19 }
 0x690   :  { %v1953_v23 = vsub.f32 0.0, %v1945_v20 }
 0x691   :  { %2937 = dma.done.wait [#allocation3 + $0x2], 4096 }
 0x692   :  { %2938 = vsyncadd [#allocation3 + $0x2], 4294963200  ;;  %v4481_v24 = vld [vmem:[#allocation67_spill] sm:$0xff]  ;;  %v4483_v26 = vld [vmem:[#allocation76_spill] sm:$0xff]  ;;  %v1954_v28 = vmax.f32 %v1953_v23, 0.0  ;;  %v1952_v62 = vmax.f32 %v1945_v20, 0.0 }
 0x693   :  { %2658 = vmatpush3.bf16.msra.mxu0 %v4481_v24  ;;  %v4482_v25 = vld [vmem:[#allocation83_spill] sm:$0xff]  ;;  %v4484_v27 = vld [vmem:[#allocation92_spill] sm:$0xff]  ;;  %v4487_v33 = vld [vmem:[#allocation77_spill] sm:$0xff] }
 0x694   :  { %2680 = vmatpush3.bf16.msra.mxu1 %v4482_v25  ;;  %2659 = vmatprep.subr.bf16.mxu0 %v4483_v26  ;;  %v1962_v29 = vpack.c.bf16 %v1954_v28, %v1954_v28  ;;  %v1959_v30 = vrot.slane %v1954_v28, 4  ;;  %v4485_v31 = vld [vmem:[#allocation68_spill] sm:$0xff]  ;;  %v4488_v40 = vld [vmem:[#allocation93_spill] sm:$0xff]  ;;  %v4491_v49 = vld [vmem:[#allocation78_spill] sm:$0xff]  ;;  %v1956_v35 = vrot.slane %v1952_v62, 4  ;;  %v1961_v55 = vpack.c.bf16 %v1952_v62, %v1952_v62 }
 0x695   :  { %2681 = vmatprep.subr.bf16.mxu1 %v4484_v27  ;;  %v4486_v32 = vld [vmem:[#allocation84_spill] sm:$0xff]  ;;  %v4489_v42 = vld [vmem:[#allocation69_spill] sm:$0xff]  ;;  %v4492_v56 = vld [vmem:[#allocation94_spill] sm:$0xff] }
 0x696   :  { %v1964_v41 = vpack.c.bf16 %v1959_v30, %v1959_v30  ;;  %2034 = vmatprep.mubr.bf16.mxu0 %v1962_v29  ;;  %v4490_v48 = vld [vmem:[#allocation85_spill] sm:$0xff]  ;;  %v4493_v57 = vld [vmem:[#allocation70_spill] sm:$0xff]  ;;  %v4495_v46 = vld [vmem:[#allocation79_spill] sm:$0xff]  ;;  %v1963_v58 = vpack.c.bf16 %v1956_v35, %v1956_v35 }
 0x697   :  { %2660 = vmatpush3.bf16.msra.mxu0 %v4485_v31  ;;  %v4494_v61 = vld [vmem:[#allocation86_spill] sm:$0xff]  ;;  %v4496_v47 = vld [vmem:[#allocation95_spill] sm:$0xff]  ;;  %v4499_v53 = vld [vmem:[#allocation80_spill] sm:$0xff] }
 0x698   :  { %2682 = vmatpush3.bf16.msra.mxu1 %v4486_v32  ;;  %2661 = vmatprep.subr.bf16.mxu0 %v4487_v33  ;;  %v4497_v37 = vld [vmem:[#allocation71_spill] sm:$0xff]  ;;  %v4500_v36 = vld [vmem:[#allocation96_spill] sm:$0xff]  ;;  %v4503_v44 = vld [vmem:[#allocation81_spill] sm:$0xff] }
 0x699   :  { %2683 = vmatprep.subr.bf16.mxu1 %v4488_v40  ;;  %2074 = vmatprep.mubr.bf16.mxu1 %v1964_v41  ;;  %v4498_v52 = vld [vmem:[#allocation87_spill] sm:$0xff]  ;;  %v4501_v45 = vld [vmem:[#allocation72_spill] sm:$0xff]  ;;  %v4504_v60 = vld [vmem:[#allocation97_spill] sm:$0xff] }
 0x69a   :  { %v4502_v51 = vld [vmem:[#allocation88_spill] sm:$0xff]  ;;  %v4505_v34 = vld [vmem:[#allocation73_spill] sm:$0xff]  ;;  %v4507_v63 = vld [vmem:[#allocation82_spill] sm:$0xff] }
 0x69b   :  { %2662 = vmatpush3.bf16.msra.mxu0 %v4489_v42  ;;  %v4506_v50 = vld [vmem:[#allocation89_spill] sm:$0xff]  ;;  %v4508_v59 = vld [vmem:[#allocation98_spill] sm:$0xff]  ;;  %v2490_v8 = vld [vmem:[%s4301_s4 + $0x5] ss:$0 sm:$0xff] }
 0x69c   :  { %2684 = vmatpush3.bf16.msra.mxu1 %v4490_v48  ;;  %2663 = vmatprep.subr.bf16.mxu0 %v4491_v49  ;;  %v4509_v38 = vld [vmem:[#allocation74_spill] sm:$0xff]  ;;  %v4511_v13 = vld [vmem:[#allocation107_spill] sm:$0xff] }
 0x69d   :  { %2685 = vmatprep.subr.bf16.mxu1 %v4492_v56  ;;  %v4510_v43 = vld [vmem:[#allocation90_spill] sm:$0xff]  ;;  %v4512_v14 = vld [vmem:[#allocation123_spill] sm:$0xff] }
 0x69f   :  { %2664 = vmatpush3.bf16.msra.mxu0 %v4493_v57 }
 0x6a0   :  { %2686 = vmatpush3.bf16.msra.mxu1 %v4494_v61  ;;  %2665 = vmatprep.subr.bf16.mxu0 %v4495_v46 }
 0x6a1   :  { %2687 = vmatprep.subr.bf16.mxu1 %v4496_v47 }
 0x6a3   :  { %2666 = vmatpush3.bf16.msra.mxu0 %v4497_v37 }
 0x6a4   :  { %2688 = vmatpush3.bf16.msra.mxu1 %v4498_v52  ;;  %2667 = vmatprep.subr.bf16.mxu0 %v4499_v53 }
 0x6a5   :  { %2689 = vmatprep.subr.bf16.mxu1 %v4500_v36 }
 0x6a7   :  { %2668 = vmatpush3.bf16.msra.mxu0 %v4501_v45 }
 0x6a8   :  { %2690 = vmatpush3.bf16.msra.mxu1 %v4502_v51  ;;  %2669 = vmatprep.subr.bf16.mxu0 %v4503_v44 }
 0x6a9   :  { %2691 = vmatprep.subr.bf16.mxu1 %v4504_v60 }
 0x6ab   :  { %2670 = vmatpush3.bf16.msra.mxu0 %v4505_v34 }
 0x6ac   :  { %2692 = vmatpush3.bf16.msra.mxu1 %v4506_v50  ;;  %2671 = vmatprep.subr.bf16.mxu0 %v4507_v63 }
 0x6ad   :  { %2693 = vmatprep.subr.bf16.mxu1 %v4508_v59 }
 0x6af   :  { %2672 = vmatpush3.bf16.msra.mxu0 %v4509_v38 }
 0x6b0   :  { %2694 = vmatpush3.bf16.msra.mxu1 %v4510_v43  ;;  %2701 = vmatprep.subr.bf16.mxu0 %v4511_v13 }
 0x6b1   :  { %2723 = vmatprep.subr.bf16.mxu1 %v4512_v14 }
 0x6b2   :  { %2035 = vmatmul.mubr.bf16.vlgmr.msra.gmra.mrb[28].mxu0 %v1961_v55 }
 0x6b3   :  { %2075 = vmatmul.mubr.bf16.vlgmr.msra.gmra.mrb[28].mxu1 %v1963_v58 }
 0x785   :  { %v2673_v54 = vpop.f32.mrb[28].mxu0 }
 0x786   :  { %v2695_v39 = vpop.f32.mrb[28].mxu1  ;;  %v2674_v0 = vpop.f32.mrb[29].mxu0 }
 0x787   :  { %v2696_v1 = vpop.f32.mrb[29].mxu1  ;;  %v2675_v2 = vadd.f32 %v2674_v0, %v2673_v54  ;;  %v2676_v4 = vpop.f32.mrb[30].mxu0 }
 0x788   :  { %v2697_v3 = vadd.f32 %v2696_v1, %v2695_v39  ;;  %v2698_v9 = vpop.f32.mrb[30].mxu1  ;;  %v2677_v10 = vpop.f32.mrb[31].mxu0 }
 0x789   :  { %v2699_v11 = vpop.f32.mrb[31].mxu1  ;;  %v2037_v5 = vadd.f32 %v2675_v2, %v2490_v8 }
 0x78b   :  { %v2077_v12 = vadd.f32 %v2697_v3, %v2037_v5 }
 0x78d   :  { %v2085_v16 = vsub.f32 0.0, %v2077_v12 }
 0x78e   :  { %2939 = dma.done.wait [#allocation3 + $0x3], 4096 }
 0x78f   :  { %2940 = vsyncadd [#allocation3 + $0x3], 4294963200  ;;  %v4513_v17 = vld [vmem:[#allocation99_spill] sm:$0xff]  ;;  %v4515_v15 = vld [vmem:[#allocation108_spill] sm:$0xff]  ;;  %v2086_v18 = vmax.f32 %v2085_v16, 0.0  ;;  %v2084_v49 = vmax.f32 %v2077_v12, 0.0 }
 0x790   :  { %2702 = vmatpush3.bf16.msra.mxu0 %v4513_v17  ;;  %v4514_v6 = vld [vmem:[#allocation115_spill] sm:$0xff]  ;;  %v4516_v7 = vld [vmem:[#allocation124_spill] sm:$0xff]  ;;  %v4519_v23 = vld [vmem:[#allocation109_spill] sm:$0xff] }
 0x791   :  { %2724 = vmatpush3.bf16.msra.mxu1 %v4514_v6  ;;  %2703 = vmatprep.subr.bf16.mxu0 %v4515_v15  ;;  %v2094_v19 = vpack.c.bf16 %v2086_v18, %v2086_v18  ;;  %v2091_v20 = vrot.slane %v2086_v18, 2  ;;  %v4517_v21 = vld [vmem:[#allocation100_spill] sm:$0xff]  ;;  %v4520_v24 = vld [vmem:[#allocation125_spill] sm:$0xff]  ;;  %v4523_v28 = vld [vmem:[#allocation110_spill] sm:$0xff]  ;;  %v2088_v47 = vrot.slane %v2084_v49, 2  ;;  %v2093_v62 = vpack.c.bf16 %v2084_v49, %v2084_v49 }
 0x792   :  { %2725 = vmatprep.subr.bf16.mxu1 %v4516_v7  ;;  %v4518_v22 = vld [vmem:[#allocation116_spill] sm:$0xff]  ;;  %v4521_v26 = vld [vmem:[#allocation101_spill] sm:$0xff]  ;;  %v4524_v29 = vld [vmem:[#allocation126_spill] sm:$0xff] }
 0x793   :  { %v2096_v25 = vpack.c.bf16 %v2091_v20, %v2091_v20  ;;  %2166 = vmatprep.mubr.bf16.mxu0 %v2094_v19  ;;  %v4522_v27 = vld [vmem:[#allocation117_spill] sm:$0xff]  ;;  %v4525_v30 = vld [vmem:[#allocation102_spill] sm:$0xff]  ;;  %v4527_v32 = vld [vmem:[#allocation111_spill] sm:$0xff]  ;;  %v2095_v45 = vpack.c.bf16 %v2088_v47, %v2088_v47 }
 0x794   :  { %2704 = vmatpush3.bf16.msra.mxu0 %v4517_v21  ;;  %v4526_v31 = vld [vmem:[#allocation118_spill] sm:$0xff]  ;;  %v4528_v33 = vld [vmem:[#allocation127_spill] sm:$0xff]  ;;  %v4531_v42 = vld [vmem:[#allocation112_spill] sm:$0xff] }
 0x795   :  { %2726 = vmatpush3.bf16.msra.mxu1 %v4518_v22  ;;  %2705 = vmatprep.subr.bf16.mxu0 %v4519_v23  ;;  %v4529_v40 = vld [vmem:[#allocation103_spill] sm:$0xff]  ;;  %v4532_v48 = vld [vmem:[#allocation128_spill] sm:$0xff]  ;;  %v4535_v61 = vld [vmem:[#allocation113_spill] sm:$0xff] }
 0x796   :  { %2727 = vmatprep.subr.bf16.mxu1 %v4520_v24  ;;  %2206 = vmatprep.mubr.bf16.mxu1 %v2096_v25  ;;  %v4530_v41 = vld [vmem:[#allocation119_spill] sm:$0xff]  ;;  %v4533_v56 = vld [vmem:[#allocation104_spill] sm:$0xff]  ;;  %v4536_v46 = vld [vmem:[#allocation129_spill] sm:$0xff] }
 0x797   :  { %v4534_v57 = vld [vmem:[#allocation120_spill] sm:$0xff]  ;;  %v4537_v37 = vld [vmem:[#allocation105_spill] sm:$0xff]  ;;  %v4539_v53 = vld [vmem:[#allocation114_spill] sm:$0xff] }
 0x798   :  { %2706 = vmatpush3.bf16.msra.mxu0 %v4521_v26  ;;  %v4538_v52 = vld [vmem:[#allocation121_spill] sm:$0xff]  ;;  %v4540_v36 = vld [vmem:[#allocation130_spill] sm:$0xff]  ;;  %v2491_v34 = vld [vmem:[%s4301_s4 + $0x6] ss:$0 sm:$0xff] }
 0x799   :  { %2728 = vmatpush3.bf16.msra.mxu1 %v4522_v27  ;;  %2707 = vmatprep.subr.bf16.mxu0 %v4523_v28  ;;  %v4541_v51 = vld [vmem:[#allocation106_spill] sm:$0xff] }
 0x79a   :  { %2729 = vmatprep.subr.bf16.mxu1 %v4524_v29  ;;  %v4542_v44 = vld [vmem:[#allocation122_spill] sm:$0xff] }
 0x79c   :  { %2708 = vmatpush3.bf16.msra.mxu0 %v4525_v30 }
 0x79d   :  { %2730 = vmatpush3.bf16.msra.mxu1 %v4526_v31  ;;  %2709 = vmatprep.subr.bf16.mxu0 %v4527_v32 }
 0x79e   :  { %2731 = vmatprep.subr.bf16.mxu1 %v4528_v33 }
 0x7a0   :  { %2710 = vmatpush3.bf16.msra.mxu0 %v4529_v40 }
 0x7a1   :  { %2732 = vmatpush3.bf16.msra.mxu1 %v4530_v41  ;;  %2711 = vmatprep.subr.bf16.mxu0 %v4531_v42 }
 0x7a2   :  { %2733 = vmatprep.subr.bf16.mxu1 %v4532_v48 }
 0x7a4   :  { %2712 = vmatpush3.bf16.msra.mxu0 %v4533_v56 }
 0x7a5   :  { %2734 = vmatpush3.bf16.msra.mxu1 %v4534_v57  ;;  %2713 = vmatprep.subr.bf16.mxu0 %v4535_v61 }
 0x7a6   :  { %2735 = vmatprep.subr.bf16.mxu1 %v4536_v46 }
 0x7a8   :  { %2714 = vmatpush3.bf16.msra.mxu0 %v4537_v37 }
 0x7a9   :  { %2736 = vmatpush3.bf16.msra.mxu1 %v4538_v52  ;;  %2715 = vmatprep.subr.bf16.mxu0 %v4539_v53 }
 0x7aa   :  { %2737 = vmatprep.subr.bf16.mxu1 %v4540_v36 }
 0x7ac   :  { %2716 = vmatpush3.bf16.msra.mxu0 %v4541_v51 }
 0x7ad   :  { %2738 = vmatpush3.bf16.msra.mxu1 %v4542_v44 }
 0x7af   :  { %2167 = vmatmul.mubr.bf16.vlgmr.msra.gmra.mrb[32].mxu0 %v2093_v62 }
 0x7b0   :  { %2207 = vmatmul.mubr.bf16.vlgmr.msra.gmra.mrb[32].mxu1 %v2095_v45 }
 0x882   :  { %v2717_v60 = vpop.f32.mrb[32].mxu0 }
 0x883   :  { %v2739_v35 = vpop.f32.mrb[32].mxu1  ;;  %v2718_v50 = vpop.f32.mrb[33].mxu0 }
 0x884   :  { %v2740_v63 = vpop.f32.mrb[33].mxu1  ;;  %v2719_v59 = vadd.f32 %v2718_v50, %v2717_v60  ;;  %v2720_v58 = vpop.f32.mrb[34].mxu0 }
 0x885   :  { %v2741_v55 = vadd.f32 %v2740_v63, %v2739_v35  ;;  %v2742_v38 = vpop.f32.mrb[34].mxu1  ;;  %v2721_v43 = vpop.f32.mrb[35].mxu0 }
 0x886   :  { %v2743_v54 = vpop.f32.mrb[35].mxu1  ;;  %v2169_v39 = vadd.f32 %v2719_v59, %v2491_v34 }
 0x888   :  { %v2209_v8 = vadd.f32 %v2741_v55, %v2169_v39 }
 0x88a   :  { %v2215_v0 = vsub.f32 0.0, %v2209_v8  ;;  %v2214_v1 = vmax.f32 %v2209_v8, 0.0 }
 0x88c   :  { %v2216_v2 = vmax.f32 %v2215_v0, 0.0 }
 0x88e   :  { %v2219_v3 = vcombine.low %v2214_v1, %v2216_v2 }
 0x890   :  { %2492 = vst.sshfl [vmem:[%s4303_s6] sm:$0x33 pattern:$0x76325410] %v2219_v3 }
 0x891   :  { %2237 = vsyncmov [#allocation3] }
 0x894   :  { %s2238_s4 = vpop.sfrf %2237 }
 0x895   :  { %p2493_p0 = scmp.ne.s32.totalorder %s2238_s4, 0 }
 0x897   :  { %2242 = shalt.err (%p2493_p0)  }
 0x898   :  { %2244 = vsyncmov [#allocation3 + $0x1] }
 0x89b   :  { %s2245_s15 = vpop.sfrf %2244 }
 0x89c   :  { %p2494_p1 = scmp.ne.s32.totalorder %s2245_s15, 0 }
 0x89e   :  { %2249 = shalt.err (%p2494_p1)  }
 0x89f   :  { %2251 = vsyncmov [#allocation3 + $0x2] }
 0x8a2   :  { %s2252_s16 = vpop.sfrf %2251 }
 0x8a3   :  { %p2495_p2 = scmp.ne.s32.totalorder %s2252_s16, 0 }
 0x8a5   :  { %2256 = shalt.err (%p2495_p2)  }
 0x8a6   :  { %2258 = vsyncmov [#allocation3 + $0x3] }
 0x8a9   :  { %s2259_s17 = vpop.sfrf %2258 }
 0x8aa   :  { %p2496_p3 = scmp.ne.s32.totalorder %s2259_s17, 0 }
 0x8ac   :  { %2263 = shalt.err (%p2496_p3)  }

</bundles_post_ra>
